<compile_context>
chip_gen: v7x
topology: tpu7x:2x2x1
jax: 0.10.0
libtpu: 0.0.40
codegen_flags: <defaults>
</compile_context>

<pallas_src>
import functools

import jax
import jax.numpy as jnp
from jax.experimental import pallas as pl
from jax.experimental.pallas import tpu as pltpu

_NEG = -1e9  # large finite negative (avoids NaN from -inf * 0 in padded slots)


def _crf_tile_kernel(logits_ref, labels_ref, p_ref, expp_ref, c_ref, s_ref, e_ref,
                     out_ref, alpha_ref, prevoh_ref, gold_ref, *, t_tile):
    t_blk = pl.program_id(1)
    nt = pl.num_programs(1)

    bt, _, vp = logits_ref.shape
    c = c_ref[...]        # (1, Vp)   per-column max of P
    S = s_ref[...]        # (1, Vp)
    E = e_ref[...]        # (1, Vp)
    P = p_ref[...]        # (Vp, Vp)
    expP = expp_ref[...]  # (Vp, Vp)  exp(P - c)

    # ---- init carried state at the first time tile of each batch block ----
    @pl.when(t_blk == 0)
    def _():
        alpha_ref[...] = logits_ref[:, 0, :].astype(jnp.float32) + S
        prevoh_ref[...] = jnp.zeros_like(prevoh_ref)
        gold_ref[...] = jnp.zeros_like(gold_ref)

    alpha = alpha_ref[...]      # (bt, Vp)  log-alpha carry
    prevoh = prevoh_ref[...]    # (bt, Vp)  one-hot of previous step's label
    gold = gold_ref[...]        # (bt, 1)   running gold-path score
    iota_v = jax.lax.broadcasted_iota(jnp.int32, (bt, vp), 1)
    is_first_blk = t_blk == 0

    # ---- bounded unroll over the local time steps of this tile ----
    for k in range(t_tile):
        x_k = logits_ref[:, k, :].astype(jnp.float32)                   # (bt, Vp)
        oh_k = (labels_ref[:, k, :] == iota_v).astype(jnp.float32)      # (bt, Vp)

        # forward recurrence: logsumexp_i(alpha[i] + P[i, j]) via the MXU
        m = jnp.max(alpha, axis=-1, keepdims=True)                      # (bt, 1)
        s_mm = jnp.dot(jnp.exp(alpha - m), expP,
                       preferred_element_type=jnp.float32)              # (bt, Vp)
        rec = m + c + jnp.log(s_mm) + x_k

        # gold-path score: emission + transition (one-hot row gather of P)
        emit_k = jnp.sum(x_k * oh_k, axis=-1, keepdims=True)            # (bt, 1)
        p_row = jnp.dot(prevoh, P, preferred_element_type=jnp.float32)  # (bt, Vp)
        trans_k = jnp.sum(p_row * oh_k, axis=-1, keepdims=True)         # (bt, 1)

        if k == 0:
            # Global step 0 keeps the init alpha (S + logits_0) and replaces the
            # "transition into step 0" with the start score S[labels[:, 0]].
            alpha = jnp.where(is_first_blk, alpha, rec)
            start_k = jnp.sum(S * oh_k, axis=-1, keepdims=True)
            gold = gold + emit_k + jnp.where(is_first_blk, start_k, trans_k)
        else:
            alpha = rec
            gold = gold + emit_k + trans_k
        prevoh = oh_k

    alpha_ref[...] = alpha
    prevoh_ref[...] = prevoh
    gold_ref[...] = gold

    # ---- finalize: partition function, end score, per-row nll ----
    @pl.when(t_blk == nt - 1)
    def _():
        zs = alpha + E
        mz = jnp.max(zs, axis=-1, keepdims=True)
        log_Z = mz + jnp.log(jnp.sum(jnp.exp(zs - mz), axis=-1, keepdims=True))
        gold_f = gold + jnp.sum(E * prevoh, axis=-1, keepdims=True)     # E[labels[:,-1]]
        nll_rows = log_Z - gold_f                                       # (bt, 1)
        out_ref[...] = jnp.broadcast_to(nll_rows, out_ref.shape)        # lane-dense store


def _pick_tile(n, target, align):
    """Largest divisor of n that is <= target and a multiple of `align`; else n."""
    if n <= target:
        return n
    for d in range(min(target, n), 0, -1):
        if n % d == 0 and d % align == 0:
            return d
    return n


def crf_loss(logits, labels, P, S=None, E=None, size_average=True,
             t_tile_target=16, b_tile_target=128):
    """Pallas CRF NLL matching CRFLoss._forward / CRFF.forward.  Returns shape (1,)."""
    B, T, V = logits.shape
    vp = max(128, ((V + 127) // 128) * 128)

    P32 = P.astype(jnp.float32)
    if vp != V:
        logits_in = jnp.pad(logits, ((0, 0), (0, 0), (0, vp - V)),
                            constant_values=_NEG)
        P_p = jnp.pad(P32, ((0, vp - V), (0, vp - V)), constant_values=_NEG)
    else:
        logits_in = logits
        P_p = P32

    S_p = jnp.zeros((1, vp), jnp.float32)
    if S is not None:
        S_p = S_p.at[0, :V].set(S.astype(jnp.float32).reshape(V))
    E_p = jnp.zeros((1, vp), jnp.float32)
    if E is not None:
        E_p = E_p.at[0, :V].set(E.astype(jnp.float32).reshape(V))

    # Hoisted once: per-column max and max-shifted exp(P) (the MXU operand).
    c = jnp.max(P_p, axis=0, keepdims=True)     # (1, vp)
    expP = jnp.exp(P_p - c)                     # (vp, vp)

    labels3 = labels.astype(jnp.int32)[:, :, None]   # (B, T, 1) -> tiles like logits

    bt = _pick_tile(B, b_tile_target, 8)        # batch tile ("parallel" grid axis)
    tt = _pick_tile(T, t_tile_target, 8)        # time tile  ("arbitrary" grid axis)
    nb, nt = B // bt, T // tt

    itemsize = jnp.dtype(logits_in.dtype).itemsize
    est_vmem = (2 * (bt * tt * vp * itemsize + bt * tt * 4)    # double-buffered tiles
                + 2 * vp * vp * 4                              # P + expP
                + 3 * vp * 4 + bt * 128 * 4                    # c/S/E + out block
                + (2 * bt * vp + bt) * 4)                      # scratch
    # NOTE: re-derive tile targets if this approaches v7x's 64 MiB VMEM.
    vmem_limit = int(min(max(est_vmem + (4 << 20), 32 << 20), 96 << 20))

    flops = 4 * B * T * vp * vp                 # 2 (bt,vp)x(vp,vp) matmuls per step
    transcendentals = 2 * B * T * vp + B * vp
    bytes_accessed = (logits_in.size * itemsize + labels3.size * 4
                      + 2 * vp * vp * 4 + B * 128 * 4)

    out = pl.pallas_call(
        functools.partial(_crf_tile_kernel, t_tile=tt),
        out_shape=jax.ShapeDtypeStruct((B, 128), jnp.float32),
        grid_spec=pltpu.PrefetchScalarGridSpec(
            num_scalar_prefetch=0,
            grid=(nb, nt),
            in_specs=[
                pl.BlockSpec((bt, tt, vp), lambda b, t: (b, t, 0)),   # logits (streamed)
                pl.BlockSpec((bt, tt, 1), lambda b, t: (b, t, 0)),    # labels (streamed)
                pl.BlockSpec((vp, vp), lambda b, t: (0, 0)),          # P
                pl.BlockSpec((vp, vp), lambda b, t: (0, 0)),          # exp(P - c)
                pl.BlockSpec((1, vp), lambda b, t: (0, 0)),           # c
                pl.BlockSpec((1, vp), lambda b, t: (0, 0)),           # S
                pl.BlockSpec((1, vp), lambda b, t: (0, 0)),           # E
            ],
            out_specs=pl.BlockSpec((bt, 128), lambda b, t: (b, 0)),
            scratch_shapes=[
                pltpu.VMEM((bt, vp), jnp.float32),   # alpha carry
                pltpu.VMEM((bt, vp), jnp.float32),   # previous-step one-hot
                pltpu.VMEM((bt, 1), jnp.float32),    # running gold score
            ],
        ),
        compiler_params=pltpu.CompilerParams(
            dimension_semantics=("parallel", "arbitrary"),
            vmem_limit_bytes=vmem_limit,
        ),
        cost_estimate=pl.CostEstimate(
            flops=flops, transcendentals=transcendentals,
            bytes_accessed=bytes_accessed),
    )(logits_in, labels3, P_p, expP, c, S_p, E_p)

    nll = jnp.sum(out[:, 0])         # tiny epilogue: batch reduction
    if size_average:
        nll = nll / B
    return nll.reshape(1)


# TODO(synk): CRFF.backward (the hand-written gradient) is not implemented; this
# kernel covers the forward NLL only.


# ---- pure-JAX reference (mirrors the PyTorch code) for verification -----------
def crf_loss_ref(logits, labels, P, S, E, size_average=True):
    B, T, V = logits.shape
    Sv = jnp.zeros((V,), jnp.float32) if S is None else S.astype(jnp.float32)
    Ev = jnp.zeros((V,), jnp.float32) if E is None else E.astype(jnp.float32)
    logits = logits.astype(jnp.float32)
    P = P.astype(jnp.float32)
    alpha = logits[:, 0, :] + Sv[None, :]
    for t in range(1, T):
        alpha = (jax.nn.logsumexp(alpha[:, :, None] + P[None, :, :], axis=1)
                 + logits[:, t, :])
    log_Z = jax.nn.logsumexp(alpha + Ev[None, :], axis=1)
    y_emit = jnp.take_along_axis(logits, labels[:, :, None], axis=2)[..., 0].sum(1)
    y_trans = P[labels[:, :-1], labels[:, 1:]].sum(1) if T > 1 else 0.0
    log_M = y_emit + y_trans + Sv[labels[:, 0]] + Ev[labels[:, -1]]
    nll = jnp.sum(log_Z - log_M)
    if size_average:
        nll = nll / B
    return nll.reshape(1)


if __name__ == "__main__":
    key = jax.random.PRNGKey(0)

    # --- case 1: CRFLoss(vocab_size=16, start=True, end=True), B=2, T=8 ---
    B, T, V = 2, 8, 16
    k1, k2, k3, k4, k5 = jax.random.split(key, 5)
    logits = jax.random.normal(k1, (B, T, V), jnp.float32)
    labels = jax.random.randint(k2, (B, T), 0, V, jnp.int32)
    P = jax.random.normal(k3, (V, V), jnp.float32)        # nn.init.normal(P, 0, 1)
    S = 0.1 * jax.random.normal(k4, (V,), jnp.float32)
    E = 0.1 * jax.random.normal(k5, (V,), jnp.float32)

    nll = jax.block_until_ready(crf_loss(logits, labels, P, S, E, size_average=True))
    nll_ref = crf_loss_ref(logits, labels, P, S, E, size_average=True)
    assert nll.shape == (1,)
    assert jnp.allclose(nll, nll_ref, rtol=1e-4, atol=1e-4), (nll, nll_ref)

    # --- case 2: S=None/E=None, multi-tile T (exercises the carried scratch) ---
    B2, T2, V2 = 4, 24, 20
    k6, k7, k8 = jax.random.split(k5, 3)
    logits2 = jax.random.normal(k6, (B2, T2, V2), jnp.float32)
    labels2 = jax.random.randint(k7, (B2, T2), 0, V2, jnp.int32)
    P2 = jax.random.normal(k8, (V2, V2), jnp.float32)

    nll2 = jax.block_until_ready(
        crf_loss(logits2, labels2, P2, None, None, size_average=False,
                 t_tile_target=8))
    nll2_ref = crf_loss_ref(logits2, labels2, P2, None, None, size_average=False)
    assert jnp.allclose(nll2, nll2_ref, rtol=1e-4, atol=1e-4), (nll2, nll2_ref)

    print("KERNEL_OK")
</pallas_src>

<mosaic_0001>
module attributes {stable_mosaic.version = 11 : i64} {
  func.func @_crf_tile_kernel(%arg0: i32, %arg1: i32, %arg2: memref<2x8x128xf32, #tpu.memory_space<vmem>>, %arg3: memref<2x8x1xi32, #tpu.memory_space<vmem>>, %arg4: memref<128x128xf32, #tpu.memory_space<vmem>>, %arg5: memref<128x128xf32, #tpu.memory_space<vmem>>, %arg6: memref<1x128xf32, #tpu.memory_space<vmem>>, %arg7: memref<1x128xf32, #tpu.memory_space<vmem>>, %arg8: memref<1x128xf32, #tpu.memory_space<vmem>>, %arg9: memref<2x128xf32, #tpu.memory_space<vmem>>, %arg10: memref<2x128xf32, #tpu.memory_space<vmem>>, %arg11: memref<2x128xf32, #tpu.memory_space<vmem>>, %arg12: memref<2x1xf32, #tpu.memory_space<vmem>>) attributes {dimension_semantics = [#tpu.dimension_semantics<parallel>, #tpu.dimension_semantics<arbitrary>], iteration_bounds = array<i64: 1, 1>, scalar_prefetch = 0 : i64, scratch_operands = 3 : i64, tpu.core_type = #tpu.core_type<tc>, window_params = [{transform_indices = @transform_0, window_bounds = array<i64: 2, 8, 128>}, {transform_indices = @transform_1, window_bounds = array<i64: 2, 8, 1>}, {pipeline_mode = #tpu.pipeline_mode<synchronous>, transform_indices = @transform_2, window_bounds = array<i64: 128, 128>}, {pipeline_mode = #tpu.pipeline_mode<synchronous>, transform_indices = @transform_3, window_bounds = array<i64: 128, 128>}, {pipeline_mode = #tpu.pipeline_mode<synchronous>, transform_indices = @transform_4, window_bounds = array<i64: 1, 128>}, {pipeline_mode = #tpu.pipeline_mode<synchronous>, transform_indices = @transform_5, window_bounds = array<i64: 1, 128>}, {pipeline_mode = #tpu.pipeline_mode<synchronous>, transform_indices = @transform_6, window_bounds = array<i64: 1, 128>}, {transform_indices = @transform_7, window_bounds = array<i64: 2, 128>}]} {
    %c0 = arith.constant 0 : index
    %c0_0 = arith.constant 0 : index
    %0 = vector.load %arg6[%c0, %c0_0] : memref<1x128xf32, #tpu.memory_space<vmem>>, vector<1x128xf32>
    %c0_1 = arith.constant 0 : index
    %c0_2 = arith.constant 0 : index
    %1 = vector.load %arg7[%c0_1, %c0_2] : memref<1x128xf32, #tpu.memory_space<vmem>>, vector<1x128xf32>
    %c0_3 = arith.constant 0 : index
    %c0_4 = arith.constant 0 : index
    %2 = vector.load %arg8[%c0_3, %c0_4] : memref<1x128xf32, #tpu.memory_space<vmem>>, vector<1x128xf32>
    %c0_5 = arith.constant 0 : index
    %c0_6 = arith.constant 0 : index
    %3 = vector.load %arg4[%c0_5, %c0_6] : memref<128x128xf32, #tpu.memory_space<vmem>>, vector<128x128xf32>
    %c0_7 = arith.constant 0 : index
    %c0_8 = arith.constant 0 : index
    %4 = vector.load %arg5[%c0_7, %c0_8] : memref<128x128xf32, #tpu.memory_space<vmem>>, vector<128x128xf32>
    %c0_i32 = arith.constant 0 : i32
    %5 = arith.cmpi eq, %arg1, %c0_i32 : i32
    %6 = arith.extui %5 : i1 to i32
    %c0_i32_9 = arith.constant 0 : i32
    %7 = arith.cmpi ne, %6, %c0_i32_9 : i32
    scf.if %7 {
      %c0_106 = arith.constant 0 : index
      %c0_107 = arith.constant 0 : index
      %c0_108 = arith.constant 0 : index
      %257 = vector.load %arg2[%c0_106, %c0_107, %c0_108] : memref<2x8x128xf32, #tpu.memory_space<vmem>>, vector<2x1x128xf32>
      %258 = vector.shape_cast %257 : vector<2x1x128xf32> to vector<2x128xf32>
      %259 = vector.broadcast %1 : vector<1x128xf32> to vector<2x128xf32>
      %260 = arith.addf %258, %259 : vector<2x128xf32>
      %c0_109 = arith.constant 0 : index
      %c0_110 = arith.constant 0 : index
      %261 = vector.load %arg10[%c0_109, %c0_110] : memref<2x128xf32, #tpu.memory_space<vmem>>, vector<2x128xf32>
      tpu.vector_store %arg10[%c0_109, %c0_110], %260 {strides = array<i32>} : memref<2x128xf32, #tpu.memory_space<vmem>>, vector<2x128xf32>,
      %cst_111 = arith.constant 0.000000e+00 : f32
      %262 = vector.broadcast %cst_111 : f32 to vector<2x128xf32>
      %c0_112 = arith.constant 0 : index
      %c0_113 = arith.constant 0 : index
      %263 = vector.load %arg11[%c0_112, %c0_113] : memref<2x128xf32, #tpu.memory_space<vmem>>, vector<2x128xf32>
      tpu.vector_store %arg11[%c0_112, %c0_113], %262 {strides = array<i32>} : memref<2x128xf32, #tpu.memory_space<vmem>>, vector<2x128xf32>,
      %cst_114 = arith.constant 0.000000e+00 : f32
      %264 = vector.broadcast %cst_114 : f32 to vector<2x1xf32>
      %c0_115 = arith.constant 0 : index
      %c0_116 = arith.constant 0 : index
      %265 = vector.load %arg12[%c0_115, %c0_116] : memref<2x1xf32, #tpu.memory_space<vmem>>, vector<2x1xf32>
      tpu.vector_store %arg12[%c0_115, %c0_116], %264 {strides = array<i32>} : memref<2x1xf32, #tpu.memory_space<vmem>>, vector<2x1xf32>,
    } else {
    }
    %c0_10 = arith.constant 0 : index
    %c0_11 = arith.constant 0 : index
    %8 = vector.load %arg10[%c0_10, %c0_11] : memref<2x128xf32, #tpu.memory_space<vmem>>, vector<2x128xf32>
    %c0_12 = arith.constant 0 : index
    %c0_13 = arith.constant 0 : index
    %9 = vector.load %arg11[%c0_12, %c0_13] : memref<2x128xf32, #tpu.memory_space<vmem>>, vector<2x128xf32>
    %c0_14 = arith.constant 0 : index
    %c0_15 = arith.constant 0 : index
    %10 = vector.load %arg12[%c0_14, %c0_15] : memref<2x1xf32, #tpu.memory_space<vmem>>, vector<2x1xf32>
    %11 = tpu.iota {dimensions = array<i32: 1>} : vector<2x128xi32>
    %c0_i32_16 = arith.constant 0 : i32
    %12 = arith.cmpi eq, %arg1, %c0_i32_16 : i32
    %c0_17 = arith.constant 0 : index
    %c0_18 = arith.constant 0 : index
    %c0_19 = arith.constant 0 : index
    %13 = vector.load %arg2[%c0_17, %c0_18, %c0_19] : memref<2x8x128xf32, #tpu.memory_space<vmem>>, vector<2x1x128xf32>
    %14 = vector.shape_cast %13 : vector<2x1x128xf32> to vector<2x128xf32>
    %c0_20 = arith.constant 0 : index
    %c0_21 = arith.constant 0 : index
    %c0_22 = arith.constant 0 : index
    %15 = vector.load %arg3[%c0_20, %c0_21, %c0_22] : memref<2x8x1xi32, #tpu.memory_space<vmem>>, vector<2x1x1xi32>
    %16 = vector.shape_cast %15 : vector<2x1x1xi32> to vector<2x1xi32>
    %17 = vector.broadcast %16 : vector<2x1xi32> to vector<2x128xi32>
    %18 = arith.cmpi eq, %17, %11 : vector<2x128xi32>
    %19 = arith.extui %18 : vector<2x128xi1> to vector<2x128xi32>
    %20 = arith.sitofp %19 : vector<2x128xi32> to vector<2x128xf32>
    %cst = arith.constant dense<0xFF800000> : vector<2xf32>
    %21 = vector.multi_reduction <maximumf>, %8, %cst [1] : vector<2x128xf32> to vector<2xf32>
    %22 = vector.shape_cast %21 : vector<2xf32> to vector<2x1xf32>
    %23 = vector.broadcast %22 : vector<2x1xf32> to vector<2x128xf32>
    %24 = arith.subf %8, %23 : vector<2x128xf32>
    %25 = math.exp %24 : vector<2x128xf32>
    %cst_23 = arith.constant dense<0.000000e+00> : vector<2x128xf32>
    %26 = tpu.matmul %25, %4, %cst_23 {dimension_numbers = #tpu.dot_dimension_numbers<[1], [0], [0], [1], [0, 0, 1, 1], [], []>} : vector<2x128xf32>, vector<128x128xf32>, vector<2x128xf32> -> vector<2x128xf32>
    %27 = vector.broadcast %22 : vector<2x1xf32> to vector<2x128xf32>
    %28 = vector.broadcast %0 : vector<1x128xf32> to vector<2x128xf32>
    %29 = arith.addf %27, %28 : vector<2x128xf32>
    %30 = math.log %26 : vector<2x128xf32>
    %31 = arith.addf %29, %30 : vector<2x128xf32>
    %32 = arith.addf %31, %14 : vector<2x128xf32>
    %33 = arith.mulf %14, %20 : vector<2x128xf32>
    %cst_24 = arith.constant dense<0.000000e+00> : vector<2xf32>
    %34 = vector.multi_reduction <add>, %33, %cst_24 [1] : vector<2x128xf32> to vector<2xf32>
    %35 = vector.shape_cast %34 : vector<2xf32> to vector<2x1xf32>
    %cst_25 = arith.constant dense<0.000000e+00> : vector<2x128xf32>
    %36 = tpu.matmul %9, %3, %cst_25 {dimension_numbers = #tpu.dot_dimension_numbers<[1], [0], [0], [1], [0, 0, 1, 1], [], []>} : vector<2x128xf32>, vector<128x128xf32>, vector<2x128xf32> -> vector<2x128xf32>
    %37 = arith.mulf %36, %20 : vector<2x128xf32>
    %cst_26 = arith.constant dense<0.000000e+00> : vector<2xf32>
    %38 = vector.multi_reduction <add>, %37, %cst_26 [1] : vector<2x128xf32> to vector<2xf32>
    %39 = vector.shape_cast %38 : vector<2xf32> to vector<2x1xf32>
    %40 = arith.select %12, %8, %32 : vector<2x128xf32>
    %41 = vector.broadcast %1 : vector<1x128xf32> to vector<2x128xf32>
    %42 = arith.mulf %41, %20 : vector<2x128xf32>
    %cst_27 = arith.constant dense<0.000000e+00> : vector<2xf32>
    %43 = vector.multi_reduction <add>, %42, %cst_27 [1] : vector<2x128xf32> to vector<2xf32>
    %44 = vector.shape_cast %43 : vector<2xf32> to vector<2x1xf32>
    %45 = arith.addf %10, %35 : vector<2x1xf32>
    %46 = arith.select %12, %44, %39 : vector<2x1xf32>
    %47 = arith.addf %45, %46 : vector<2x1xf32>
    %c0_28 = arith.constant 0 : index
    %c1 = arith.constant 1 : index
    %c0_29 = arith.constant 0 : index
    %48 = vector.load %arg2[%c0_28, %c1, %c0_29] : memref<2x8x128xf32, #tpu.memory_space<vmem>>, vector<2x1x128xf32>
    %49 = vector.shape_cast %48 : vector<2x1x128xf32> to vector<2x128xf32>
    %c0_30 = arith.constant 0 : index
    %c1_31 = arith.constant 1 : index
    %c0_32 = arith.constant 0 : index
    %50 = vector.load %arg3[%c0_30, %c1_31, %c0_32] : memref<2x8x1xi32, #tpu.memory_space<vmem>>, vector<2x1x1xi32>
    %51 = vector.shape_cast %50 : vector<2x1x1xi32> to vector<2x1xi32>
    %52 = vector.broadcast %51 : vector<2x1xi32> to vector<2x128xi32>
    %53 = arith.cmpi eq, %52, %11 : vector<2x128xi32>
    %54 = arith.extui %53 : vector<2x128xi1> to vector<2x128xi32>
    %55 = arith.sitofp %54 : vector<2x128xi32> to vector<2x128xf32>
    %cst_33 = arith.constant dense<0xFF800000> : vector<2xf32>
    %56 = vector.multi_reduction <maximumf>, %40, %cst_33 [1] : vector<2x128xf32> to vector<2xf32>
    %57 = vector.shape_cast %56 : vector<2xf32> to vector<2x1xf32>
    %58 = vector.broadcast %57 : vector<2x1xf32> to vector<2x128xf32>
    %59 = arith.subf %40, %58 : vector<2x128xf32>
    %60 = math.exp %59 : vector<2x128xf32>
    %cst_34 = arith.constant dense<0.000000e+00> : vector<2x128xf32>
    %61 = tpu.matmul %60, %4, %cst_34 {dimension_numbers = #tpu.dot_dimension_numbers<[1], [0], [0], [1], [0, 0, 1, 1], [], []>} : vector<2x128xf32>, vector<128x128xf32>, vector<2x128xf32> -> vector<2x128xf32>
    %62 = vector.broadcast %57 : vector<2x1xf32> to vector<2x128xf32>
    %63 = vector.broadcast %0 : vector<1x128xf32> to vector<2x128xf32>
    %64 = arith.addf %62, %63 : vector<2x128xf32>
    %65 = math.log %61 : vector<2x128xf32>
    %66 = arith.addf %64, %65 : vector<2x128xf32>
    %67 = arith.addf %66, %49 : vector<2x128xf32>
    %68 = arith.mulf %49, %55 : vector<2x128xf32>
    %cst_35 = arith.constant dense<0.000000e+00> : vector<2xf32>
    %69 = vector.multi_reduction <add>, %68, %cst_35 [1] : vector<2x128xf32> to vector<2xf32>
    %70 = vector.shape_cast %69 : vector<2xf32> to vector<2x1xf32>
    %cst_36 = arith.constant dense<0.000000e+00> : vector<2x128xf32>
    %71 = tpu.matmul %20, %3, %cst_36 {dimension_numbers = #tpu.dot_dimension_numbers<[1], [0], [0], [1], [0, 0, 1, 1], [], []>} : vector<2x128xf32>, vector<128x128xf32>, vector<2x128xf32> -> vector<2x128xf32>
    %72 = arith.mulf %71, %55 : vector<2x128xf32>
    %cst_37 = arith.constant dense<0.000000e+00> : vector<2xf32>
    %73 = vector.multi_reduction <add>, %72, %cst_37 [1] : vector<2x128xf32> to vector<2xf32>
    %74 = vector.shape_cast %73 : vector<2xf32> to vector<2x1xf32>
    %75 = arith.addf %47, %70 : vector<2x1xf32>
    %76 = arith.addf %75, %74 : vector<2x1xf32>
    %c0_38 = arith.constant 0 : index
    %c2 = arith.constant 2 : index
    %c0_39 = arith.constant 0 : index
    %77 = vector.load %arg2[%c0_38, %c2, %c0_39] : memref<2x8x128xf32, #tpu.memory_space<vmem>>, vector<2x1x128xf32>
    %78 = vector.shape_cast %77 : vector<2x1x128xf32> to vector<2x128xf32>
    %c0_40 = arith.constant 0 : index
    %c2_41 = arith.constant 2 : index
    %c0_42 = arith.constant 0 : index
    %79 = vector.load %arg3[%c0_40, %c2_41, %c0_42] : memref<2x8x1xi32, #tpu.memory_space<vmem>>, vector<2x1x1xi32>
    %80 = vector.shape_cast %79 : vector<2x1x1xi32> to vector<2x1xi32>
    %81 = vector.broadcast %80 : vector<2x1xi32> to vector<2x128xi32>
    %82 = arith.cmpi eq, %81, %11 : vector<2x128xi32>
    %83 = arith.extui %82 : vector<2x128xi1> to vector<2x128xi32>
    %84 = arith.sitofp %83 : vector<2x128xi32> to vector<2x128xf32>
    %cst_43 = arith.constant dense<0xFF800000> : vector<2xf32>
    %85 = vector.multi_reduction <maximumf>, %67, %cst_43 [1] : vector<2x128xf32> to vector<2xf32>
    %86 = vector.shape_cast %85 : vector<2xf32> to vector<2x1xf32>
    %87 = vector.broadcast %86 : vector<2x1xf32> to vector<2x128xf32>
    %88 = arith.subf %67, %87 : vector<2x128xf32>
    %89 = math.exp %88 : vector<2x128xf32>
    %cst_44 = arith.constant dense<0.000000e+00> : vector<2x128xf32>
    %90 = tpu.matmul %89, %4, %cst_44 {dimension_numbers = #tpu.dot_dimension_numbers<[1], [0], [0], [1], [0, 0, 1, 1], [], []>} : vector<2x128xf32>, vector<128x128xf32>, vector<2x128xf32> -> vector<2x128xf32>
    %91 = vector.broadcast %86 : vector<2x1xf32> to vector<2x128xf32>
    %92 = vector.broadcast %0 : vector<1x128xf32> to vector<2x128xf32>
    %93 = arith.addf %91, %92 : vector<2x128xf32>
    %94 = math.log %90 : vector<2x128xf32>
    %95 = arith.addf %93, %94 : vector<2x128xf32>
    %96 = arith.addf %95, %78 : vector<2x128xf32>
    %97 = arith.mulf %78, %84 : vector<2x128xf32>
    %cst_45 = arith.constant dense<0.000000e+00> : vector<2xf32>
    %98 = vector.multi_reduction <add>, %97, %cst_45 [1] : vector<2x128xf32> to vector<2xf32>
    %99 = vector.shape_cast %98 : vector<2xf32> to vector<2x1xf32>
    %cst_46 = arith.constant dense<0.000000e+00> : vector<2x128xf32>
    %100 = tpu.matmul %55, %3, %cst_46 {dimension_numbers = #tpu.dot_dimension_numbers<[1], [0], [0], [1], [0, 0, 1, 1], [], []>} : vector<2x128xf32>, vector<128x128xf32>, vector<2x128xf32> -> vector<2x128xf32>
    %101 = arith.mulf %100, %84 : vector<2x128xf32>
    %cst_47 = arith.constant dense<0.000000e+00> : vector<2xf32>
    %102 = vector.multi_reduction <add>, %101, %cst_47 [1] : vector<2x128xf32> to vector<2xf32>
    %103 = vector.shape_cast %102 : vector<2xf32> to vector<2x1xf32>
    %104 = arith.addf %76, %99 : vector<2x1xf32>
    %105 = arith.addf %104, %103 : vector<2x1xf32>
    %c0_48 = arith.constant 0 : index
    %c3 = arith.constant 3 : index
    %c0_49 = arith.constant 0 : index
    %106 = vector.load %arg2[%c0_48, %c3, %c0_49] : memref<2x8x128xf32, #tpu.memory_space<vmem>>, vector<2x1x128xf32>
    %107 = vector.shape_cast %106 : vector<2x1x128xf32> to vector<2x128xf32>
    %c0_50 = arith.constant 0 : index
    %c3_51 = arith.constant 3 : index
    %c0_52 = arith.constant 0 : index
    %108 = vector.load %arg3[%c0_50, %c3_51, %c0_52] : memref<2x8x1xi32, #tpu.memory_space<vmem>>, vector<2x1x1xi32>
    %109 = vector.shape_cast %108 : vector<2x1x1xi32> to vector<2x1xi32>
    %110 = vector.broadcast %109 : vector<2x1xi32> to vector<2x128xi32>
    %111 = arith.cmpi eq, %110, %11 : vector<2x128xi32>
    %112 = arith.extui %111 : vector<2x128xi1> to vector<2x128xi32>
    %113 = arith.sitofp %112 : vector<2x128xi32> to vector<2x128xf32>
    %cst_53 = arith.constant dense<0xFF800000> : vector<2xf32>
    %114 = vector.multi_reduction <maximumf>, %96, %cst_53 [1] : vector<2x128xf32> to vector<2xf32>
    %115 = vector.shape_cast %114 : vector<2xf32> to vector<2x1xf32>
    %116 = vector.broadcast %115 : vector<2x1xf32> to vector<2x128xf32>
    %117 = arith.subf %96, %116 : vector<2x128xf32>
    %118 = math.exp %117 : vector<2x128xf32>
    %cst_54 = arith.constant dense<0.000000e+00> : vector<2x128xf32>
    %119 = tpu.matmul %118, %4, %cst_54 {dimension_numbers = #tpu.dot_dimension_numbers<[1], [0], [0], [1], [0, 0, 1, 1], [], []>} : vector<2x128xf32>, vector<128x128xf32>, vector<2x128xf32> -> vector<2x128xf32>
    %120 = vector.broadcast %115 : vector<2x1xf32> to vector<2x128xf32>
    %121 = vector.broadcast %0 : vector<1x128xf32> to vector<2x128xf32>
    %122 = arith.addf %120, %121 : vector<2x128xf32>
    %123 = math.log %119 : vector<2x128xf32>
    %124 = arith.addf %122, %123 : vector<2x128xf32>
    %125 = arith.addf %124, %107 : vector<2x128xf32>
    %126 = arith.mulf %107, %113 : vector<2x128xf32>
    %cst_55 = arith.constant dense<0.000000e+00> : vector<2xf32>
    %127 = vector.multi_reduction <add>, %126, %cst_55 [1] : vector<2x128xf32> to vector<2xf32>
    %128 = vector.shape_cast %127 : vector<2xf32> to vector<2x1xf32>
    %cst_56 = arith.constant dense<0.000000e+00> : vector<2x128xf32>
    %129 = tpu.matmul %84, %3, %cst_56 {dimension_numbers = #tpu.dot_dimension_numbers<[1], [0], [0], [1], [0, 0, 1, 1], [], []>} : vector<2x128xf32>, vector<128x128xf32>, vector<2x128xf32> -> vector<2x128xf32>
    %130 = arith.mulf %129, %113 : vector<2x128xf32>
    %cst_57 = arith.constant dense<0.000000e+00> : vector<2xf32>
    %131 = vector.multi_reduction <add>, %130, %cst_57 [1] : vector<2x128xf32> to vector<2xf32>
    %132 = vector.shape_cast %131 : vector<2xf32> to vector<2x1xf32>
    %133 = arith.addf %105, %128 : vector<2x1xf32>
    %134 = arith.addf %133, %132 : vector<2x1xf32>
    %c0_58 = arith.constant 0 : index
    %c4 = arith.constant 4 : index
    %c0_59 = arith.constant 0 : index
    %135 = vector.load %arg2[%c0_58, %c4, %c0_59] : memref<2x8x128xf32, #tpu.memory_space<vmem>>, vector<2x1x128xf32>
    %136 = vector.shape_cast %135 : vector<2x1x128xf32> to vector<2x128xf32>
    %c0_60 = arith.constant 0 : index
    %c4_61 = arith.constant 4 : index
    %c0_62 = arith.constant 0 : index
    %137 = vector.load %arg3[%c0_60, %c4_61, %c0_62] : memref<2x8x1xi32, #tpu.memory_space<vmem>>, vector<2x1x1xi32>
    %138 = vector.shape_cast %137 : vector<2x1x1xi32> to vector<2x1xi32>
    %139 = vector.broadcast %138 : vector<2x1xi32> to vector<2x128xi32>
    %140 = arith.cmpi eq, %139, %11 : vector<2x128xi32>
    %141 = arith.extui %140 : vector<2x128xi1> to vector<2x128xi32>
    %142 = arith.sitofp %141 : vector<2x128xi32> to vector<2x128xf32>
    %cst_63 = arith.constant dense<0xFF800000> : vector<2xf32>
    %143 = vector.multi_reduction <maximumf>, %125, %cst_63 [1] : vector<2x128xf32> to vector<2xf32>
    %144 = vector.shape_cast %143 : vector<2xf32> to vector<2x1xf32>
    %145 = vector.broadcast %144 : vector<2x1xf32> to vector<2x128xf32>
    %146 = arith.subf %125, %145 : vector<2x128xf32>
    %147 = math.exp %146 : vector<2x128xf32>
    %cst_64 = arith.constant dense<0.000000e+00> : vector<2x128xf32>
    %148 = tpu.matmul %147, %4, %cst_64 {dimension_numbers = #tpu.dot_dimension_numbers<[1], [0], [0], [1], [0, 0, 1, 1], [], []>} : vector<2x128xf32>, vector<128x128xf32>, vector<2x128xf32> -> vector<2x128xf32>
    %149 = vector.broadcast %144 : vector<2x1xf32> to vector<2x128xf32>
    %150 = vector.broadcast %0 : vector<1x128xf32> to vector<2x128xf32>
    %151 = arith.addf %149, %150 : vector<2x128xf32>
    %152 = math.log %148 : vector<2x128xf32>
    %153 = arith.addf %151, %152 : vector<2x128xf32>
    %154 = arith.addf %153, %136 : vector<2x128xf32>
    %155 = arith.mulf %136, %142 : vector<2x128xf32>
    %cst_65 = arith.constant dense<0.000000e+00> : vector<2xf32>
    %156 = vector.multi_reduction <add>, %155, %cst_65 [1] : vector<2x128xf32> to vector<2xf32>
    %157 = vector.shape_cast %156 : vector<2xf32> to vector<2x1xf32>
    %cst_66 = arith.constant dense<0.000000e+00> : vector<2x128xf32>
    %158 = tpu.matmul %113, %3, %cst_66 {dimension_numbers = #tpu.dot_dimension_numbers<[1], [0], [0], [1], [0, 0, 1, 1], [], []>} : vector<2x128xf32>, vector<128x128xf32>, vector<2x128xf32> -> vector<2x128xf32>
    %159 = arith.mulf %158, %142 : vector<2x128xf32>
    %cst_67 = arith.constant dense<0.000000e+00> : vector<2xf32>
    %160 = vector.multi_reduction <add>, %159, %cst_67 [1] : vector<2x128xf32> to vector<2xf32>
    %161 = vector.shape_cast %160 : vector<2xf32> to vector<2x1xf32>
    %162 = arith.addf %134, %157 : vector<2x1xf32>
    %163 = arith.addf %162, %161 : vector<2x1xf32>
    %c0_68 = arith.constant 0 : index
    %c5 = arith.constant 5 : index
    %c0_69 = arith.constant 0 : index
    %164 = vector.load %arg2[%c0_68, %c5, %c0_69] : memref<2x8x128xf32, #tpu.memory_space<vmem>>, vector<2x1x128xf32>
    %165 = vector.shape_cast %164 : vector<2x1x128xf32> to vector<2x128xf32>
    %c0_70 = arith.constant 0 : index
    %c5_71 = arith.constant 5 : index
    %c0_72 = arith.constant 0 : index
    %166 = vector.load %arg3[%c0_70, %c5_71, %c0_72] : memref<2x8x1xi32, #tpu.memory_space<vmem>>, vector<2x1x1xi32>
    %167 = vector.shape_cast %166 : vector<2x1x1xi32> to vector<2x1xi32>
    %168 = vector.broadcast %167 : vector<2x1xi32> to vector<2x128xi32>
    %169 = arith.cmpi eq, %168, %11 : vector<2x128xi32>
    %170 = arith.extui %169 : vector<2x128xi1> to vector<2x128xi32>
    %171 = arith.sitofp %170 : vector<2x128xi32> to vector<2x128xf32>
    %cst_73 = arith.constant dense<0xFF800000> : vector<2xf32>
    %172 = vector.multi_reduction <maximumf>, %154, %cst_73 [1] : vector<2x128xf32> to vector<2xf32>
    %173 = vector.shape_cast %172 : vector<2xf32> to vector<2x1xf32>
    %174 = vector.broadcast %173 : vector<2x1xf32> to vector<2x128xf32>
    %175 = arith.subf %154, %174 : vector<2x128xf32>
    %176 = math.exp %175 : vector<2x128xf32>
    %cst_74 = arith.constant dense<0.000000e+00> : vector<2x128xf32>
    %177 = tpu.matmul %176, %4, %cst_74 {dimension_numbers = #tpu.dot_dimension_numbers<[1], [0], [0], [1], [0, 0, 1, 1], [], []>} : vector<2x128xf32>, vector<128x128xf32>, vector<2x128xf32> -> vector<2x128xf32>
    %178 = vector.broadcast %173 : vector<2x1xf32> to vector<2x128xf32>
    %179 = vector.broadcast %0 : vector<1x128xf32> to vector<2x128xf32>
    %180 = arith.addf %178, %179 : vector<2x128xf32>
    %181 = math.log %177 : vector<2x128xf32>
    %182 = arith.addf %180, %181 : vector<2x128xf32>
    %183 = arith.addf %182, %165 : vector<2x128xf32>
    %184 = arith.mulf %165, %171 : vector<2x128xf32>
    %cst_75 = arith.constant dense<0.000000e+00> : vector<2xf32>
    %185 = vector.multi_reduction <add>, %184, %cst_75 [1] : vector<2x128xf32> to vector<2xf32>
    %186 = vector.shape_cast %185 : vector<2xf32> to vector<2x1xf32>
    %cst_76 = arith.constant dense<0.000000e+00> : vector<2x128xf32>
    %187 = tpu.matmul %142, %3, %cst_76 {dimension_numbers = #tpu.dot_dimension_numbers<[1], [0], [0], [1], [0, 0, 1, 1], [], []>} : vector<2x128xf32>, vector<128x128xf32>, vector<2x128xf32> -> vector<2x128xf32>
    %188 = arith.mulf %187, %171 : vector<2x128xf32>
    %cst_77 = arith.constant dense<0.000000e+00> : vector<2xf32>
    %189 = vector.multi_reduction <add>, %188, %cst_77 [1] : vector<2x128xf32> to vector<2xf32>
    %190 = vector.shape_cast %189 : vector<2xf32> to vector<2x1xf32>
    %191 = arith.addf %163, %186 : vector<2x1xf32>
    %192 = arith.addf %191, %190 : vector<2x1xf32>
    %c0_78 = arith.constant 0 : index
    %c6 = arith.constant 6 : index
    %c0_79 = arith.constant 0 : index
    %193 = vector.load %arg2[%c0_78, %c6, %c0_79] : memref<2x8x128xf32, #tpu.memory_space<vmem>>, vector<2x1x128xf32>
    %194 = vector.shape_cast %193 : vector<2x1x128xf32> to vector<2x128xf32>
    %c0_80 = arith.constant 0 : index
    %c6_81 = arith.constant 6 : index
    %c0_82 = arith.constant 0 : index
    %195 = vector.load %arg3[%c0_80, %c6_81, %c0_82] : memref<2x8x1xi32, #tpu.memory_space<vmem>>, vector<2x1x1xi32>
    %196 = vector.shape_cast %195 : vector<2x1x1xi32> to vector<2x1xi32>
    %197 = vector.broadcast %196 : vector<2x1xi32> to vector<2x128xi32>
    %198 = arith.cmpi eq, %197, %11 : vector<2x128xi32>
    %199 = arith.extui %198 : vector<2x128xi1> to vector<2x128xi32>
    %200 = arith.sitofp %199 : vector<2x128xi32> to vector<2x128xf32>
    %cst_83 = arith.constant dense<0xFF800000> : vector<2xf32>
    %201 = vector.multi_reduction <maximumf>, %183, %cst_83 [1] : vector<2x128xf32> to vector<2xf32>
    %202 = vector.shape_cast %201 : vector<2xf32> to vector<2x1xf32>
    %203 = vector.broadcast %202 : vector<2x1xf32> to vector<2x128xf32>
    %204 = arith.subf %183, %203 : vector<2x128xf32>
    %205 = math.exp %204 : vector<2x128xf32>
    %cst_84 = arith.constant dense<0.000000e+00> : vector<2x128xf32>
    %206 = tpu.matmul %205, %4, %cst_84 {dimension_numbers = #tpu.dot_dimension_numbers<[1], [0], [0], [1], [0, 0, 1, 1], [], []>} : vector<2x128xf32>, vector<128x128xf32>, vector<2x128xf32> -> vector<2x128xf32>
    %207 = vector.broadcast %202 : vector<2x1xf32> to vector<2x128xf32>
    %208 = vector.broadcast %0 : vector<1x128xf32> to vector<2x128xf32>
    %209 = arith.addf %207, %208 : vector<2x128xf32>
    %210 = math.log %206 : vector<2x128xf32>
    %211 = arith.addf %209, %210 : vector<2x128xf32>
    %212 = arith.addf %211, %194 : vector<2x128xf32>
    %213 = arith.mulf %194, %200 : vector<2x128xf32>
    %cst_85 = arith.constant dense<0.000000e+00> : vector<2xf32>
    %214 = vector.multi_reduction <add>, %213, %cst_85 [1] : vector<2x128xf32> to vector<2xf32>
    %215 = vector.shape_cast %214 : vector<2xf32> to vector<2x1xf32>
    %cst_86 = arith.constant dense<0.000000e+00> : vector<2x128xf32>
    %216 = tpu.matmul %171, %3, %cst_86 {dimension_numbers = #tpu.dot_dimension_numbers<[1], [0], [0], [1], [0, 0, 1, 1], [], []>} : vector<2x128xf32>, vector<128x128xf32>, vector<2x128xf32> -> vector<2x128xf32>
    %217 = arith.mulf %216, %200 : vector<2x128xf32>
    %cst_87 = arith.constant dense<0.000000e+00> : vector<2xf32>
    %218 = vector.multi_reduction <add>, %217, %cst_87 [1] : vector<2x128xf32> to vector<2xf32>
    %219 = vector.shape_cast %218 : vector<2xf32> to vector<2x1xf32>
    %220 = arith.addf %192, %215 : vector<2x1xf32>
    %221 = arith.addf %220, %219 : vector<2x1xf32>
    %c0_88 = arith.constant 0 : index
    %c7 = arith.constant 7 : index
    %c0_89 = arith.constant 0 : index
    %222 = vector.load %arg2[%c0_88, %c7, %c0_89] : memref<2x8x128xf32, #tpu.memory_space<vmem>>, vector<2x1x128xf32>
    %223 = vector.shape_cast %222 : vector<2x1x128xf32> to vector<2x128xf32>
    %c0_90 = arith.constant 0 : index
    %c7_91 = arith.constant 7 : index
    %c0_92 = arith.constant 0 : index
    %224 = vector.load %arg3[%c0_90, %c7_91, %c0_92] : memref<2x8x1xi32, #tpu.memory_space<vmem>>, vector<2x1x1xi32>
    %225 = vector.shape_cast %224 : vector<2x1x1xi32> to vector<2x1xi32>
    %226 = vector.broadcast %225 : vector<2x1xi32> to vector<2x128xi32>
    %227 = arith.cmpi eq, %226, %11 : vector<2x128xi32>
    %228 = arith.extui %227 : vector<2x128xi1> to vector<2x128xi32>
    %229 = arith.sitofp %228 : vector<2x128xi32> to vector<2x128xf32>
    %cst_93 = arith.constant dense<0xFF800000> : vector<2xf32>
    %230 = vector.multi_reduction <maximumf>, %212, %cst_93 [1] : vector<2x128xf32> to vector<2xf32>
    %231 = vector.shape_cast %230 : vector<2xf32> to vector<2x1xf32>
    %232 = vector.broadcast %231 : vector<2x1xf32> to vector<2x128xf32>
    %233 = arith.subf %212, %232 : vector<2x128xf32>
    %234 = math.exp %233 : vector<2x128xf32>
    %cst_94 = arith.constant dense<0.000000e+00> : vector<2x128xf32>
    %235 = tpu.matmul %234, %4, %cst_94 {dimension_numbers = #tpu.dot_dimension_numbers<[1], [0], [0], [1], [0, 0, 1, 1], [], []>} : vector<2x128xf32>, vector<128x128xf32>, vector<2x128xf32> -> vector<2x128xf32>
    %236 = vector.broadcast %231 : vector<2x1xf32> to vector<2x128xf32>
    %237 = vector.broadcast %0 : vector<1x128xf32> to vector<2x128xf32>
    %238 = arith.addf %236, %237 : vector<2x128xf32>
    %239 = math.log %235 : vector<2x128xf32>
    %240 = arith.addf %238, %239 : vector<2x128xf32>
    %241 = arith.addf %240, %223 : vector<2x128xf32>
    %242 = arith.mulf %223, %229 : vector<2x128xf32>
    %cst_95 = arith.constant dense<0.000000e+00> : vector<2xf32>
    %243 = vector.multi_reduction <add>, %242, %cst_95 [1] : vector<2x128xf32> to vector<2xf32>
    %244 = vector.shape_cast %243 : vector<2xf32> to vector<2x1xf32>
    %cst_96 = arith.constant dense<0.000000e+00> : vector<2x128xf32>
    %245 = tpu.matmul %200, %3, %cst_96 {dimension_numbers = #tpu.dot_dimension_numbers<[1], [0], [0], [1], [0, 0, 1, 1], [], []>} : vector<2x128xf32>, vector<128x128xf32>, vector<2x128xf32> -> vector<2x128xf32>
    %246 = arith.mulf %245, %229 : vector<2x128xf32>
    %cst_97 = arith.constant dense<0.000000e+00> : vector<2xf32>
    %247 = vector.multi_reduction <add>, %246, %cst_97 [1] : vector<2x128xf32> to vector<2xf32>
    %248 = vector.shape_cast %247 : vector<2xf32> to vector<2x1xf32>
    %249 = arith.addf %221, %244 : vector<2x1xf32>
    %250 = arith.addf %249, %248 : vector<2x1xf32>
    %c0_98 = arith.constant 0 : index
    %c0_99 = arith.constant 0 : index
    %251 = vector.load %arg10[%c0_98, %c0_99] : memref<2x128xf32, #tpu.memory_space<vmem>>, vector<2x128xf32>
    tpu.vector_store %arg10[%c0_98, %c0_99], %241 {strides = array<i32>} : memref<2x128xf32, #tpu.memory_space<vmem>>, vector<2x128xf32>,
    %c0_100 = arith.constant 0 : index
    %c0_101 = arith.constant 0 : index
    %252 = vector.load %arg11[%c0_100, %c0_101] : memref<2x128xf32, #tpu.memory_space<vmem>>, vector<2x128xf32>
    tpu.vector_store %arg11[%c0_100, %c0_101], %229 {strides = array<i32>} : memref<2x128xf32, #tpu.memory_space<vmem>>, vector<2x128xf32>,
    %c0_102 = arith.constant 0 : index
    %c0_103 = arith.constant 0 : index
    %253 = vector.load %arg12[%c0_102, %c0_103] : memref<2x1xf32, #tpu.memory_space<vmem>>, vector<2x1xf32>
    tpu.vector_store %arg12[%c0_102, %c0_103], %250 {strides = array<i32>} : memref<2x1xf32, #tpu.memory_space<vmem>>, vector<2x1xf32>,
    %c0_i32_104 = arith.constant 0 : i32
    %254 = arith.cmpi eq, %arg1, %c0_i32_104 : i32
    %255 = arith.extui %254 : i1 to i32
    %c0_i32_105 = arith.constant 0 : i32
    %256 = arith.cmpi ne, %255, %c0_i32_105 : i32
    scf.if %256 {
      %257 = vector.broadcast %2 : vector<1x128xf32> to vector<2x128xf32>
      %258 = arith.addf %241, %257 : vector<2x128xf32>
      %cst_106 = arith.constant dense<0xFF800000> : vector<2xf32>
      %259 = vector.multi_reduction <maximumf>, %258, %cst_106 [1] : vector<2x128xf32> to vector<2xf32>
      %260 = vector.shape_cast %259 : vector<2xf32> to vector<2x1xf32>
      %261 = vector.broadcast %260 : vector<2x1xf32> to vector<2x128xf32>
      %262 = arith.subf %258, %261 : vector<2x128xf32>
      %263 = math.exp %262 : vector<2x128xf32>
      %cst_107 = arith.constant dense<0.000000e+00> : vector<2xf32>
      %264 = vector.multi_reduction <add>, %263, %cst_107 [1] : vector<2x128xf32> to vector<2xf32>
      %265 = vector.shape_cast %264 : vector<2xf32> to vector<2x1xf32>
      %266 = math.log %265 : vector<2x1xf32>
      %267 = arith.addf %260, %266 : vector<2x1xf32>
      %268 = vector.broadcast %2 : vector<1x128xf32> to vector<2x128xf32>
      %269 = arith.mulf %268, %229 : vector<2x128xf32>
      %cst_108 = arith.constant dense<0.000000e+00> : vector<2xf32>
      %270 = vector.multi_reduction <add>, %269, %cst_108 [1] : vector<2x128xf32> to vector<2xf32>
      %271 = vector.shape_cast %270 : vector<2xf32> to vector<2x1xf32>
      %272 = arith.addf %250, %271 : vector<2x1xf32>
      %273 = arith.subf %267, %272 : vector<2x1xf32>
      %274 = vector.shape_cast %273 : vector<2x1xf32> to vector<2x1xf32>
      %275 = vector.broadcast %274 : vector<2x1xf32> to vector<2x128xf32>
      %c0_109 = arith.constant 0 : index
      %c0_110 = arith.constant 0 : index
      %276 = vector.load %arg9[%c0_109, %c0_110] : memref<2x128xf32, #tpu.memory_space<vmem>>, vector<2x128xf32>
      tpu.vector_store %arg9[%c0_109, %c0_110], %275 {strides = array<i32>} : memref<2x128xf32, #tpu.memory_space<vmem>>, vector<2x128xf32>,
    } else {
    }
    return
  }
  func.func @transform_0(%arg0: i32, %arg1: i32) -> (i32, i32, i32) {
    %c0_i32 = arith.constant 0 : i32
    %c0_i32_0 = arith.constant 0 : i32
    return %arg0, %arg1, %c0_i32 : i32, i32, i32
  }
  func.func @transform_1(%arg0: i32, %arg1: i32) -> (i32, i32, i32) {
    %c0_i32 = arith.constant 0 : i32
    %c0_i32_0 = arith.constant 0 : i32
    return %arg0, %arg1, %c0_i32 : i32, i32, i32
  }
  func.func @transform_2(%arg0: i32, %arg1: i32) -> (i32, i32) {
    %c0_i32 = arith.constant 0 : i32
    %c0_i32_0 = arith.constant 0 : i32
    %c0_i32_1 = arith.constant 0 : i32
    return %c0_i32, %c0_i32_0 : i32, i32
  }
  func.func @transform_3(%arg0: i32, %arg1: i32) -> (i32, i32) {
    %c0_i32 = arith.constant 0 : i32
    %c0_i32_0 = arith.constant 0 : i32
    %c0_i32_1 = arith.constant 0 : i32
    return %c0_i32, %c0_i32_0 : i32, i32
  }
  func.func @transform_4(%arg0: i32, %arg1: i32) -> (i32, i32) {
    %c0_i32 = arith.constant 0 : i32
    %c0_i32_0 = arith.constant 0 : i32
    %c0_i32_1 = arith.constant 0 : i32
    return %c0_i32, %c0_i32_0 : i32, i32
  }
  func.func @transform_5(%arg0: i32, %arg1: i32) -> (i32, i32) {
    %c0_i32 = arith.constant 0 : i32
    %c0_i32_0 = arith.constant 0 : i32
    %c0_i32_1 = arith.constant 0 : i32
    return %c0_i32, %c0_i32_0 : i32, i32
  }
  func.func @transform_6(%arg0: i32, %arg1: i32) -> (i32, i32) {
    %c0_i32 = arith.constant 0 : i32
    %c0_i32_0 = arith.constant 0 : i32
    %c0_i32_1 = arith.constant 0 : i32
    return %c0_i32, %c0_i32_0 : i32, i32
  }
  func.func @transform_7(%arg0: i32, %arg1: i32) -> (i32, i32) {
    %c0_i32 = arith.constant 0 : i32
    %c0_i32_0 = arith.constant 0 : i32
    return %arg0, %c0_i32 : i32, i32
  }
}

</mosaic_0001>

<bundles_post_ra>
// kernel: tpu_custom_call.1
= control target key start
LH: loop header
LB: loop body
LE: loop exit
PB: predicated region body
PF: predicated region fallthrough
CT: control target
= control target key end

     0   :  { %12 = vsyncpa [#allocation6], 0  ;;  %s3829_s0 = inlined_call_operand.vmem [shape: f32[2,8,128], index: 0, kind: input, shape index: {}]   ;;  %s3830_s1 = inlined_call_operand.vmem [shape: s32[2,8,1], index: 1, kind: input, shape index: {}]   ;;  %s3831_s2 = inlined_call_operand.hbm [shape: f32[128,128], index: 2, kind: input, shape index: {}]   ;;  %s3832_s3 = inlined_call_operand.hbm [shape: f32[128,128], index: 3, kind: input, shape index: {}]   ;;  %s3833_s4 = inlined_call_operand.vmem [shape: f32[1,128], index: 4, kind: input, shape index: {}]   ;;  %s3834_s5 = inlined_call_operand.vmem [shape: f32[1,128], index: 5, kind: input, shape index: {}]   ;;  %s3835_s6 = inlined_call_operand.vmem [shape: f32[1,128], index: 6, kind: input, shape index: {}]   ;;  %s3836_s7 = inlined_call_operand.hbm [shape: f32[2,128], index: 7, kind: output, shape index: {}]  }
   0x1   :  { %13 = vsyncpa [#allocation9], 0 }
   0x2   :  { %14 = vsyncpa [#allocation7], 0  ;;  %s3093_s24 = smov [#allocation5]   ;;  %s3021_s28 = scalar_lea.hbm %s3831_s2, 2048 }
   0x3   :  { %s24_s25 = sshll.u32 %s3093_s24, 4  ;;  %p3022_p0 = scmp.ne.s32.totalorder %s3831_s2, %s3021_s28  ;;  %s25_s25 = int_to_ptr.vmem [resolvable:$true] %s24_s25 }
   0x4   :  { %p3025_p1 = scmp.lt.u32.totalorder %s3021_s28, %s3831_s2 }
   0x6   :  { %p3027_p2 = pnand %p3025_p1, %p3022_p0 }
   0x8   :  { %3030 = shalt.err (!%p3027_p2)
}
   0x9   :  { %s3031_s10 = scalar_lea.vmem %s25_s25, 2048  ;;  %p3036_p4 = scmp.lt.s32.totalorder %s25_s25, %s25_s25 }
   0xa   :  { %p3032_p3 = scmp.ne.s32.totalorder %s25_s25, %s3031_s10  ;;  %p3037_p5 = scmp.lt.s32.totalorder %s3031_s10, %s3031_s10 }
   0xc   :  { %p3038_p6 = por %p3037_p5, %p3036_p4 }
   0xe   :  { %p3039_p7 = pnand %p3038_p6, %p3032_p3 }
  0x10   :  { %3042 = shalt.err (!%p3039_p7)
}
  0x11   :  { %s3094_s11 = smov 128   ;;  %s3095_s12 = smov 8  }
  0x12   :  { %30 = dma.hbm_to_vmem [thread:$0]  %s3831_s2, 2048, %s25_s25, [#allocation6], %s3094_s11, %s3094_s11, %s3095_s12  }
  0x13   :  { %s3096_s15 = smov [#allocation8]   ;;  %s3043_s19 = scalar_lea.hbm %s3832_s3, 2048 }
  0x14   :  { %s36_s16 = sshll.u32 %s3096_s15, 4  ;;  %p3044_p8 = scmp.ne.s32.totalorder %s3832_s3, %s3043_s19  ;;  %s37_s16 = int_to_ptr.vmem [resolvable:$true] %s36_s16 }
  0x15   :  { %p3047_p9 = scmp.lt.u32.totalorder %s3043_s19, %s3832_s3 }
  0x17   :  { %p3049_p10 = pnand %p3047_p9, %p3044_p8 }
  0x19   :  { %3052 = shalt.err (!%p3049_p10)
}
  0x1a   :  { %s3053_s24 = scalar_lea.vmem %s37_s16, 2048  ;;  %p3058_p12 = scmp.lt.s32.totalorder %s37_s16, %s37_s16 }
  0x1b   :  { %p3054_p11 = scmp.ne.s32.totalorder %s37_s16, %s3053_s24  ;;  %p3059_p13 = scmp.lt.s32.totalorder %s3053_s24, %s3053_s24 }
  0x1d   :  { %p3060_p0 = por %p3059_p13, %p3058_p12 }
  0x1f   :  { %p3061_p1 = pnand %p3060_p0, %p3054_p11 }
  0x21   :  { %3064 = shalt.err (!%p3061_p1)
}
  0x22   :  { %42 = dma.hbm_to_vmem [thread:$0]  %s3832_s3, 2048, %s37_s16, [#allocation9], %s3094_s11, %s3094_s11, %s3095_s12  }
  0x23   :  { %3087 = dma.done.wait [#allocation6], 2048  }
  0x24   :  { %3088 = vsyncadd [#allocation6], 4294965248 }
  0x25   :  { %3089 = dma.done.wait [#allocation9], 2048  }
  0x26   :  { %3090 = vsyncadd [#allocation9], 4294965248  ;;  %v3097_v0 = vmov 0.0|0.0   ;;  %v3171_v1 = vld [vmem:[%s3834_s5] ss:$0 sm:$0xff]  ;;  %v74_v6 = vld [vmem:[#allocation8] sm:$0xff] }
  0x27   :  { %2591 = vmatprep.subr.bf16.mxu0 %v3097_v0  ;;  %2615 = vmatprep.subr.bf16.mxu1 %v3097_v0  ;;  %v94_v2 = vld [vmem:[%s3829_s0] sm:$0x1]  ;;  %v95_v3 = vld [vmem:[%s3829_s0 + $0x8] sm:$0x1]  ;;  %v75_v7 = vld [vmem:[#allocation8 + $0x8] sm:$0xff]  ;;  %vm107_vm0 = vcmask 1041409  }
  0x28   :  { %v102_v4 = vadd.f32 %v3171_v1, %v94_v2  ;;  %v103_v5 = vadd.f32 %v3171_v1, %v95_v3  ;;  %v76_v8 = vld [vmem:[#allocation8 + $0x10] sm:$0xff]  ;;  %v3181_v9 = vpack.c.bf16 %v75_v7, %v74_v6  ;;  %v77_v10 = vld [vmem:[#allocation8 + $0x18] sm:$0xff]  ;;  %v78_v14 = vld [vmem:[#allocation8 + $0x20] sm:$0xff]  ;;  %vm135_vm1 = vcmask 1041408  }
  0x29   :  { %v3184_v12 = vpack.c.bf16 %v77_v10, %v76_v8  ;;  %v79_v15 = vld [vmem:[#allocation8 + $0x28] sm:$0xff]  ;;  %v80_v17 = vld [vmem:[#allocation8 + $0x30] sm:$0xff]  ;;  %v81_v18 = vld [vmem:[#allocation8 + $0x38] sm:$0xff]  ;;  %vm3098_vm2 = vmmov 0   ;;  %v3099_v33 = vmov 0.0   ;;  %vm112_vm13 = vcmask 1024  }
  0x2a   :  { %v106_v11 = vrot.slane %v103_v5, 7  ;;  %2593 = vmatpush3.bf16.msra.mxu0 %v3181_v9  ;;  %v3189_v16 = vpack.c.bf16 %v79_v15, %v78_v14  ;;  %v3193_v19 = vpack.c.bf16 %v81_v18, %v80_v17  ;;  %v82_v21 = vld [vmem:[#allocation8 + $0x40] sm:$0xff]  ;;  %v83_v22 = vld [vmem:[#allocation8 + $0x48] sm:$0xff]  ;;  %v84_v25 = vld [vmem:[#allocation8 + $0x50] sm:$0xff]  ;;  %2063 = vmatprep.mubr.msk.f32.mxu0 %vm3098_vm2, %v3099_v33  ;;  %111 = vst [vmem:[#allocation3] sm:$0x3] %v3099_v33 }
  0x2b   :  { %2594 = vmatprep.subr.bf16.mxu0 %v3097_v0  ;;  %v3198_v24 = vpack.c.bf16 %v83_v22, %v82_v21  ;;  %v85_v26 = vld [vmem:[#allocation8 + $0x58] sm:$0xff]  ;;  %v86_v28 = vld [vmem:[#allocation8 + $0x60] sm:$0xff]  ;;  %v87_v29 = vld [vmem:[#allocation8 + $0x68] sm:$0xff]  ;;  %2098 = vmatprep.mubr.msk.f32.mxu1 %vm3098_vm2, %v3099_v33  ;;  %113 = vst.msk [vmem:[#allocation4] sm:$0x3] %vm112_vm13, %v3099_v33 }
  0x2c   :  { %v108_v13 = vsel %vm107_vm0, %v106_v11, %v102_v4  ;;  %v3203_v27 = vpack.c.bf16 %v85_v26, %v84_v25  ;;  %v88_v30 = vld [vmem:[#allocation8 + $0x70] sm:$0xff]  ;;  %v3207_v31 = vpack.c.bf16 %v87_v29, %v86_v28  ;;  %v89_v32 = vld [vmem:[#allocation8 + $0x78] sm:$0xff]  ;;  %v3259_v47 = vld [vmem:[%s3829_s0 + $0x9] sm:$0x1] }
  0x2d   :  { %110 = vst [vmem:[#allocation2] sm:$0x3] %v108_v13  ;;  %v3215_v34 = vpack.c.bf16 %v89_v32, %v88_v30  ;;  %v3264_v48 = vld [vmem:[%s3833_s4] ss:$0 sm:$0xff]  ;;  %v433_v49 = vrot.slane %v3259_v47, 7 }
  0x2e   :  { %2596 = vmatpush3.bf16.msra.mxu0 %v3184_v12  ;;  %v3270_v50 = vld [vmem:[%s3829_s0 + $0x1] sm:$0x1]  ;;  %v3297_v2 = vld [vmem:[%s3829_s0 + $0xa] sm:$0x1]  ;;  %v3303_v4 = vld [vmem:[%s3829_s0 + $0x2] sm:$0x1] }
  0x2f   :  { %2597 = vmatprep.subr.bf16.mxu0 %v3097_v0  ;;  %v434_v54 = vsel %vm107_vm0, %v433_v49, %v3270_v50  ;;  %v626_v3 = vrot.slane %v3297_v2, 7  ;;  %v3330_v22 = vld [vmem:[%s3829_s0 + $0xb] sm:$0x1]  ;;  %v3336_v25 = vld [vmem:[%s3829_s0 + $0x3] sm:$0x1] }
  0x31   :  { %v627_v8 = vsel %vm107_vm0, %v626_v3, %v3303_v4  ;;  %v58_v3 = vld [vmem:[#allocation5] sm:$0xff] }
  0x32   :  { %2599 = vmatpush3.bf16.msra.mxu0 %v3189_v16 }
  0x33   :  { %2600 = vmatprep.subr.bf16.mxu0 %v3097_v0 }
  0x34   :  { %v114_v20 = vld [vmem:[#allocation2] sm:$0x3] }
  0x35   :  { %v136_v23 = vsel %vm135_vm1, %v114_v20, -inf }
  0x36   :  { %137 = vmax.xlane.f32.xlu0 %v136_v23  ;;  %2602 = vmatpush3.bf16.msra.mxu0 %v3193_v19 }
  0x37   :  { %2603 = vmatprep.subr.bf16.mxu0 %v3097_v0 }
  0x3a   :  { %352 = vmax.xlane.f32.xlu0 %v136_v23  ;;  %2605 = vmatpush3.bf16.msra.mxu0 %v3198_v24  ;;  %v819_v23 = vrot.slane %v3330_v22, 7 }
  0x3b   :  { %2606 = vmatprep.subr.bf16.mxu0 %v3097_v0 }
  0x3c   :  { %v820_v30 = vsel %vm107_vm0, %v819_v23, %v3336_v25 }
  0x3e   :  { %2608 = vmatpush3.bf16.msra.mxu0 %v3203_v27 }
  0x3f   :  { %2609 = vmatprep.subr.bf16.mxu0 %v3097_v0 }
  0x42   :  { %2611 = vmatpush3.bf16.msra.mxu0 %v3207_v31 }
  0x43   :  { %2612 = vmatprep.subr.bf16.mxu0 %v3097_v0 }
  0x46   :  { %2614 = vmatpush3.bf16.msra.mxu0 %v3215_v34 }
  0x47   :  { %2639 = vmatprep.subr.bf16.mxu0 %v3097_v0 }
  0xc3   :  { %v138_v35 = vpop.xlane.xlu0 %137 }
  0xc4   :  { %v139_v36 = vsub.f32 %v114_v20, %v138_v35 }
  0xc6   :  { %v140_v37 = vmul.f32 1.442695, %v139_v36 }
  0xc7   :  { %v353_v39 = vpop.xlane.xlu0 %352 }
  0xc8   :  { %2986 = vpow2.f32 %v140_v37  ;;  %v354_v40 = vsub.f32 %v114_v20, %v353_v39  ;;  %v427_v52 = vadd.f32 %v3264_v48, %v353_v39 }
  0xca   :  { %v355_v41 = vmul.f32 1.442695, %v354_v40 }
  0xcc   :  { %2988 = vpow2.f32 %v355_v41 }
  0xd2   :  { %v2987_v38 = vpop.eup %2986 }
  0xd3   :  { %2064 = vmatmul.mubr.f32.vlgmr.msra.gmra.mrb[0].mxu0 %v2987_v38 }
  0xd4   :  { %2641 = vmatpush3.bf16.msra.mxu0 %v3181_v9  ;;  %2133 = vmatprep.mubr.msk.f32.mxu0 %vm3098_vm2, %v3099_v33 }
  0xd5   :  { %2642 = vmatprep.subr.bf16.mxu0 %v3097_v0 }
  0xd6   :  { %v2989_v42 = vpop.eup %2988 }
  0xd8   :  { %2644 = vmatpush3.bf16.msra.mxu0 %v3184_v12 }
  0xd9   :  { %2645 = vmatprep.subr.bf16.mxu0 %v3097_v0 }
  0xdc   :  { %2647 = vmatpush3.bf16.msra.mxu0 %v3189_v16 }
  0xdd   :  { %2648 = vmatprep.subr.bf16.mxu0 %v3097_v0 }
  0xe0   :  { %2650 = vmatpush3.bf16.msra.mxu0 %v3193_v19 }
  0xe1   :  { %2651 = vmatprep.subr.bf16.mxu0 %v3097_v0 }
  0xe4   :  { %2653 = vmatpush3.bf16.msra.mxu0 %v3198_v24 }
  0xe5   :  { %2654 = vmatprep.subr.bf16.mxu0 %v3097_v0 }
  0xe8   :  { %2656 = vmatpush3.bf16.msra.mxu0 %v3203_v27 }
  0xe9   :  { %2657 = vmatprep.subr.bf16.mxu0 %v3097_v0 }
  0xec   :  { %2659 = vmatpush3.bf16.msra.mxu0 %v3207_v31 }
  0xed   :  { %2660 = vmatprep.subr.bf16.mxu0 %v3097_v0 }
  0xf0   :  { %2662 = vmatpush3.bf16.msra.mxu0 %v3215_v34 }
  0xf1   :  { %2687 = vmatprep.subr.bf16.mxu0 %v3097_v0 }
  0xf3   :  { %2134 = vmatmul.mubr.f32.vlgmr.msra.gmra.mrb[2].mxu0 %v2989_v42 }
  0xf4   :  { %2689 = vmatpush3.bf16.msra.mxu0 %v3181_v9  ;;  %2203 = vmatprep.mubr.msk.f32.mxu0 %vm3098_vm2, %v3099_v33 }
  0xf5   :  { %2690 = vmatprep.subr.bf16.mxu0 %v3097_v0 }
  0xf8   :  { %2692 = vmatpush3.bf16.msra.mxu0 %v3184_v12 }
  0xf9   :  { %2693 = vmatprep.subr.bf16.mxu0 %v3097_v0 }
  0xfc   :  { %2695 = vmatpush3.bf16.msra.mxu0 %v3189_v16 }
  0xfd   :  { %2696 = vmatprep.subr.bf16.mxu0 %v3097_v0 }
 0x100   :  { %2698 = vmatpush3.bf16.msra.mxu0 %v3193_v19 }
 0x101   :  { %2699 = vmatprep.subr.bf16.mxu0 %v3097_v0 }
 0x104   :  { %2701 = vmatpush3.bf16.msra.mxu0 %v3198_v24 }
 0x105   :  { %2702 = vmatprep.subr.bf16.mxu0 %v3097_v0 }
 0x108   :  { %2704 = vmatpush3.bf16.msra.mxu0 %v3203_v27 }
 0x109   :  { %2705 = vmatprep.subr.bf16.mxu0 %v3097_v0 }
 0x10c   :  { %2707 = vmatpush3.bf16.msra.mxu0 %v3207_v31 }
 0x10d   :  { %2708 = vmatprep.subr.bf16.mxu0 %v3097_v0 }
 0x110   :  { %2710 = vmatpush3.bf16.msra.mxu0 %v3215_v34 }
 0x111   :  { %2735 = vmatprep.subr.bf16.mxu0 %v3097_v0 }
 0x1a6   :  { %v208_v43 = vpop.f32.mrb[0].mxu0 }
 0x1a7   :  { %v2065_v44 = vpop.f32.mrb[1].mxu0  ;;  %v3363_v43 = vld [vmem:[%s3829_s0 + $0xc] sm:$0x1] }
 0x1a8   :  { %v1012_v44 = vrot.slane %v3363_v43, 7 }
 0x1c6   :  { %v423_v45 = vpop.f32.mrb[2].mxu0 }
 0x1c7   :  { %2990 = vlog2.f32 %v423_v45  ;;  %v2135_v46 = vpop.f32.mrb[3].mxu0  ;;  %v3369_v45 = vld [vmem:[%s3829_s0 + $0x4] sm:$0x1] }
 0x1d1   :  { %v2991_v51 = vpop.eup %2990 }
 0x1d2   :  { %v429_v53 = vmul.f32 0.6931472, %v2991_v51 }
 0x1d4   :  { %v430_v55 = vadd.f32 %v429_v53, %v427_v52  ;;  %v1013_v52 = vsel %vm107_vm0, %v1012_v44, %v3369_v45  ;;  %v69_v44 = vld [vmem:[#allocation5 + $0x58] sm:$0xff] }
 0x1d6   :  { %v436_v56 = vadd.f32 %v434_v54, %v430_v55 }
 0x1d8   :  { %v544_v57 = vsel %vm135_vm1, %v436_v56, -inf }
 0x1d9   :  { %545 = vmax.xlane.f32.xlu1 %v544_v57 }
 0x266   :  { %v546_v58 = vpop.xlane.xlu1 %545 }
 0x267   :  { %v547_v59 = vsub.f32 %v436_v56, %v546_v58  ;;  %v620_v6 = vadd.f32 %v3264_v48, %v546_v58 }
 0x269   :  { %v548_v60 = vmul.f32 1.442695, %v547_v59 }
 0x26b   :  { %2992 = vpow2.f32 %v548_v60  ;;  %v122_v60 = vld [vmem:[%s3830_s1 + $0x8] sm:$0x1] }
 0x275   :  { %v2993_v61 = vpop.eup %2992 }
 0x276   :  { %2204 = vmatmul.mubr.f32.vlgmr.msra.gmra.mrb[4].mxu0 %v2993_v61  ;;  %v3100_v61 = vmov 0  }
 0x277   :  { %2737 = vmatpush3.bf16.msra.mxu0 %v3181_v9  ;;  %2273 = vmatprep.mubr.msk.f32.mxu0 %vm3098_vm2, %v3099_v33 }
 0x278   :  { %2738 = vmatprep.subr.bf16.mxu0 %v3097_v0  ;;  %2984 = vset.pattern.permute.xlu1 %v3100_v61 }
 0x279   :  { %2985 = vset.pattern.permute.xlu0 %v3100_v61  ;;  %v723_v61 = vld [vmem:[%s3830_s1 + $0x3] sm:$0x1] }
 0x27b   :  { %2740 = vmatpush3.bf16.msra.mxu0 %v3184_v12 }
 0x27c   :  { %2741 = vmatprep.subr.bf16.mxu0 %v3097_v0 }
 0x27f   :  { %2743 = vmatpush3.bf16.msra.mxu0 %v3189_v16 }
 0x280   :  { %2744 = vmatprep.subr.bf16.mxu0 %v3097_v0 }
 0x283   :  { %2746 = vmatpush3.bf16.msra.mxu0 %v3193_v19 }
 0x284   :  { %2747 = vmatprep.subr.bf16.mxu0 %v3097_v0 }
 0x287   :  { %2749 = vmatpush3.bf16.msra.mxu0 %v3198_v24 }
 0x288   :  { %2750 = vmatprep.subr.bf16.mxu0 %v3097_v0 }
 0x28b   :  { %2752 = vmatpush3.bf16.msra.mxu0 %v3203_v27 }
 0x28c   :  { %2753 = vmatprep.subr.bf16.mxu0 %v3097_v0 }
 0x28f   :  { %2755 = vmatpush3.bf16.msra.mxu0 %v3207_v31 }
 0x290   :  { %2756 = vmatprep.subr.bf16.mxu0 %v3097_v0 }
 0x293   :  { %2758 = vmatpush3.bf16.msra.mxu0 %v3215_v34 }
 0x294   :  { %2783 = vmatprep.subr.bf16.mxu0 %v3097_v0 }
 0x349   :  { %v616_v62 = vpop.f32.mrb[4].mxu0 }
 0x34a   :  { %2994 = vlog2.f32 %v616_v62  ;;  %v2205_v63 = vpop.f32.mrb[5].mxu0  ;;  %v338_v62 = vld [vmem:[%s3830_s1 + $0x9] sm:$0x1] }
 0x34b   :  { %v337_v63 = vld [vmem:[%s3830_s1 + $0x1] sm:$0x1] }
 0x354   :  { %v2995_v5 = vpop.eup %2994 }
 0x355   :  { %v622_v7 = vmul.f32 0.6931472, %v2995_v5  ;;  %v59_v5 = vld [vmem:[#allocation5 + $0x8] sm:$0xff] }
 0x357   :  { %v623_v10 = vadd.f32 %v622_v7, %v620_v6  ;;  %v60_v6 = vld [vmem:[#allocation5 + $0x10] sm:$0xff]  ;;  %v3405_v7 = vpack.c.bf16 %v59_v5, %v58_v3  ;;  %v1109_v3 = vld [vmem:[%s3830_s1 + $0x5] sm:$0x1]  ;;  %v1303_v5 = vld [vmem:[%s3830_s1 + $0xe] sm:$0x1] }
 0x359   :  { %v629_v11 = vadd.f32 %v627_v8, %v623_v10  ;;  %v61_v8 = vld [vmem:[#allocation5 + $0x18] sm:$0xff]  ;;  %2617 = vmatpush3.bf16.msra.mxu1 %v3405_v7 }
 0x35a   :  { %v3408_v10 = vpack.c.bf16 %v61_v8, %v60_v6  ;;  %2618 = vmatprep.subr.bf16.mxu1 %v3097_v0  ;;  %v97_v6 = vlaneseq }
 0x35b   :  { %v737_v13 = vsel %vm135_vm1, %v629_v11, -inf }
 0x35c   :  { %738 = vmax.xlane.f32.xlu1 %v737_v13  ;;  %v63_v13 = vld [vmem:[#allocation5 + $0x28] sm:$0xff]  ;;  %v3498_v8 = vand.u32 127, %v97_v6 }
 0x35d   :  { %2620 = vmatpush3.bf16.msra.mxu1 %v3408_v10 }
 0x35e   :  { %2621 = vmatprep.subr.bf16.mxu1 %v3097_v0 }
 0x3e9   :  { %v739_v14 = vpop.xlane.xlu1 %738 }
 0x3ea   :  { %v740_v15 = vsub.f32 %v629_v11, %v739_v14  ;;  %v813_v28 = vadd.f32 %v3264_v48, %v739_v14  ;;  %v62_v11 = vld [vmem:[#allocation5 + $0x20] sm:$0xff] }
 0x3eb   :  { %v3412_v14 = vpack.c.bf16 %v63_v13, %v62_v11 }
 0x3ec   :  { %v741_v17 = vmul.f32 1.442695, %v740_v15  ;;  %v64_v15 = vld [vmem:[#allocation5 + $0x30] sm:$0xff] }
 0x3ed   :  { %2623 = vmatpush3.bf16.msra.mxu1 %v3412_v14 }
 0x3ee   :  { %2996 = vpow2.f32 %v741_v17  ;;  %v65_v17 = vld [vmem:[#allocation5 + $0x38] sm:$0xff]  ;;  %2624 = vmatprep.subr.bf16.mxu1 %v3097_v0 }
 0x3f8   :  { %v2997_v18 = vpop.eup %2996 }
 0x3f9   :  { %2274 = vmatmul.mubr.f32.vlgmr.msra.gmra.mrb[6].mxu0 %v2997_v18  ;;  %v3416_v18 = vpack.c.bf16 %v65_v17, %v64_v15 }
 0x3fa   :  { %2785 = vmatpush3.bf16.msra.mxu0 %v3181_v9  ;;  %2343 = vmatprep.mubr.msk.f32.mxu0 %vm3098_vm2, %v3099_v33 }
 0x3fb   :  { %2786 = vmatprep.subr.bf16.mxu0 %v3097_v0  ;;  %2626 = vmatpush3.bf16.msra.mxu1 %v3416_v18 }
 0x3fc   :  { %2627 = vmatprep.subr.bf16.mxu1 %v3097_v0 }
 0x3fe   :  { %2788 = vmatpush3.bf16.msra.mxu0 %v3184_v12 }
 0x3ff   :  { %2789 = vmatprep.subr.bf16.mxu0 %v3097_v0 }
 0x402   :  { %2791 = vmatpush3.bf16.msra.mxu0 %v3189_v16 }
 0x403   :  { %2792 = vmatprep.subr.bf16.mxu0 %v3097_v0 }
 0x406   :  { %2794 = vmatpush3.bf16.msra.mxu0 %v3193_v19 }
 0x407   :  { %2795 = vmatprep.subr.bf16.mxu0 %v3097_v0 }
 0x40a   :  { %2797 = vmatpush3.bf16.msra.mxu0 %v3198_v24 }
 0x40b   :  { %2798 = vmatprep.subr.bf16.mxu0 %v3097_v0 }
 0x40e   :  { %2800 = vmatpush3.bf16.msra.mxu0 %v3203_v27 }
 0x40f   :  { %2801 = vmatprep.subr.bf16.mxu0 %v3097_v0 }
 0x412   :  { %2803 = vmatpush3.bf16.msra.mxu0 %v3207_v31 }
 0x413   :  { %2804 = vmatprep.subr.bf16.mxu0 %v3097_v0 }
 0x416   :  { %2806 = vmatpush3.bf16.msra.mxu0 %v3215_v34 }
 0x417   :  { %2831 = vmatprep.subr.bf16.mxu0 %v3097_v0 }
 0x4cc   :  { %v809_v20 = vpop.f32.mrb[6].mxu0 }
 0x4cd   :  { %2998 = vlog2.f32 %v809_v20  ;;  %v2275_v21 = vpop.f32.mrb[7].mxu0  ;;  %v66_v20 = vld [vmem:[#allocation5 + $0x40] sm:$0xff] }
 0x4ce   :  { %v67_v21 = vld [vmem:[#allocation5 + $0x48] sm:$0xff] }
 0x4cf   :  { %v3420_v23 = vpack.c.bf16 %v67_v21, %v66_v20 }
 0x4d1   :  { %2629 = vmatpush3.bf16.msra.mxu1 %v3420_v23 }
 0x4d2   :  { %2630 = vmatprep.subr.bf16.mxu1 %v3097_v0 }
 0x4d7   :  { %v2999_v26 = vpop.eup %2998 }
 0x4d8   :  { %v815_v29 = vmul.f32 0.6931472, %v2999_v26 }
 0x4da   :  { %v816_v32 = vadd.f32 %v815_v29, %v813_v28  ;;  %v3428_v29 = vld [vmem:[%s3829_s0 + $0xd] sm:$0x1] }
 0x4dc   :  { %v822_v35 = vadd.f32 %v820_v30, %v816_v32  ;;  %v1205_v30 = vrot.slane %v3428_v29, 7  ;;  %v3434_v32 = vld [vmem:[%s3829_s0 + $0x5] sm:$0x1] }
 0x4de   :  { %v930_v36 = vsel %vm135_vm1, %v822_v35, -inf }
 0x4df   :  { %931 = vmax.xlane.f32.xlu0 %v930_v36 }
 0x56c   :  { %v932_v37 = vpop.xlane.xlu0 %931 }
 0x56d   :  { %v933_v38 = vsub.f32 %v822_v35, %v932_v37  ;;  %v1006_v49 = vadd.f32 %v3264_v48, %v932_v37 }
 0x56f   :  { %v934_v39 = vmul.f32 1.442695, %v933_v38  ;;  %v1206_v38 = vsel %vm107_vm0, %v1205_v30, %v3434_v32 }
 0x571   :  { %3000 = vpow2.f32 %v934_v39 }
 0x57b   :  { %v3001_v40 = vpop.eup %3000 }
 0x57c   :  { %2344 = vmatmul.mubr.f32.vlgmr.msra.gmra.mrb[8].mxu0 %v3001_v40 }
 0x57d   :  { %2833 = vmatpush3.bf16.msra.mxu0 %v3181_v9  ;;  %2413 = vmatprep.mubr.msk.f32.mxu0 %vm3098_vm2, %v3099_v33 }
 0x57e   :  { %2834 = vmatprep.subr.bf16.mxu0 %v3097_v0 }
 0x581   :  { %2836 = vmatpush3.bf16.msra.mxu0 %v3184_v12 }
 0x582   :  { %2837 = vmatprep.subr.bf16.mxu0 %v3097_v0 }
 0x585   :  { %2839 = vmatpush3.bf16.msra.mxu0 %v3189_v16 }
 0x586   :  { %2840 = vmatprep.subr.bf16.mxu0 %v3097_v0 }
 0x589   :  { %2842 = vmatpush3.bf16.msra.mxu0 %v3193_v19 }
 0x58a   :  { %2843 = vmatprep.subr.bf16.mxu0 %v3097_v0 }
 0x58d   :  { %2845 = vmatpush3.bf16.msra.mxu0 %v3198_v24 }
 0x58e   :  { %2846 = vmatprep.subr.bf16.mxu0 %v3097_v0 }
 0x591   :  { %2848 = vmatpush3.bf16.msra.mxu0 %v3203_v27 }
 0x592   :  { %2849 = vmatprep.subr.bf16.mxu0 %v3097_v0 }
 0x595   :  { %2851 = vmatpush3.bf16.msra.mxu0 %v3207_v31 }
 0x596   :  { %2852 = vmatprep.subr.bf16.mxu0 %v3097_v0 }
 0x599   :  { %2854 = vmatpush3.bf16.msra.mxu0 %v3215_v34 }
 0x59a   :  { %2879 = vmatprep.subr.bf16.mxu0 %v3097_v0 }
 0x64f   :  { %v1002_v41 = vpop.f32.mrb[8].mxu0 }
 0x650   :  { %3002 = vlog2.f32 %v1002_v41  ;;  %v2345_v42 = vpop.f32.mrb[9].mxu0 }
 0x651   :  { %v68_v42 = vld [vmem:[#allocation5 + $0x50] sm:$0xff] }
 0x65a   :  { %v3003_v46 = vpop.eup %3002 }
 0x65b   :  { %v1008_v51 = vmul.f32 0.6931472, %v3003_v46  ;;  %v3441_v46 = vpack.c.bf16 %v69_v44, %v68_v42 }
 0x65d   :  { %v1009_v53 = vadd.f32 %v1008_v51, %v1006_v49  ;;  %2632 = vmatpush3.bf16.msra.mxu1 %v3441_v46  ;;  %v70_v49 = vld [vmem:[#allocation5 + $0x60] sm:$0xff]  ;;  %v71_v51 = vld [vmem:[#allocation5 + $0x68] sm:$0xff] }
 0x65e   :  { %2633 = vmatprep.subr.bf16.mxu1 %v3097_v0 }
 0x65f   :  { %v1015_v54 = vadd.f32 %v1013_v52, %v1009_v53  ;;  %v3445_v52 = vpack.c.bf16 %v71_v51, %v70_v49  ;;  %v72_v53 = vld [vmem:[#allocation5 + $0x70] sm:$0xff] }
 0x661   :  { %v1123_v55 = vsel %vm135_vm1, %v1015_v54, -inf  ;;  %2635 = vmatpush3.bf16.msra.mxu1 %v3445_v52 }
 0x662   :  { %1124 = vmax.xlane.f32.xlu1 %v1123_v55  ;;  %v121_v55 = vld [vmem:[%s3830_s1] sm:$0x1]  ;;  %2636 = vmatprep.subr.bf16.mxu1 %v3097_v0 }
 0x673   :  { %127 = vperm.xlu1 %2984, %v122_v60   ;;  %v724_v60 = vld [vmem:[%s3830_s1 + $0xb] sm:$0x1] }
 0x677   :  { %343 = vperm.xlu1 %2984, %v338_v62   ;;  %v916_v62 = vld [vmem:[%s3830_s1 + $0x4] sm:$0x1] }
 0x67b   :  { %340 = vperm.xlu1 %2984, %v337_v63   ;;  %v1110_v63 = vld [vmem:[%s3830_s1 + $0xd] sm:$0x1] }
 0x6ef   :  { %v3375_v56 = vpop.xlane.xlu1 %1124 }
 0x6f0   :  { %v1126_v57 = vsub.f32 %v1015_v54, %v3375_v56  ;;  %v1199_v36 = vadd.f32 %v3264_v48, %v3375_v56  ;;  %v73_v54 = vld [vmem:[#allocation5 + $0x78] sm:$0xff] }
 0x6f1   :  { %v3451_v56 = vpack.c.bf16 %v73_v54, %v72_v53 }
 0x6f2   :  { %v1127_v58 = vmul.f32 1.442695, %v1126_v57  ;;  %v531_v57 = vld [vmem:[%s3830_s1 + $0xa] sm:$0x1] }
 0x6f3   :  { %2638 = vmatpush3.bf16.msra.mxu1 %v3451_v56  ;;  %v128_v11 = vpop.permute.xlu1 %127 }
 0x6f4   :  { %3004 = vpow2.f32 %v1127_v58  ;;  %v115_v58 = vld [vmem:[#allocation3] sm:$0x3]  ;;  %2663 = vmatprep.subr.bf16.mxu1 %v3097_v0  ;;  %vm130_vm3 = vcmp.eq.s32.totalorder %v128_v11, %v3498_v8 }
 0x6f5   :  { %v3505_v20 = vsel %vm130_vm3, 1.0, %v3099_v33 }
 0x6f6   :  { %2099 = vmatmul.mubr.f32.vlgmr.msra.gmra.mrb[0].mxu1 %v115_v58  ;;  %v311_v21 = vrot.slane %v3505_v20, 7 }
 0x6f7   :  { %2665 = vmatpush3.bf16.msra.mxu1 %v3405_v7  ;;  %2168 = vmatprep.mubr.msk.f32.mxu1 %vm3098_vm2, %v3099_v33 }
 0x6f8   :  { %2666 = vmatprep.subr.bf16.mxu1 %v3097_v0 }
 0x6fb   :  { %2668 = vmatpush3.bf16.msra.mxu1 %v3408_v10 }
 0x6fc   :  { %2669 = vmatprep.subr.bf16.mxu1 %v3097_v0 }
 0x6fe   :  { %v3005_v59 = vpop.eup %3004 }
 0x6ff   :  { %2414 = vmatmul.mubr.f32.vlgmr.msra.gmra.mrb[10].mxu0 %v3005_v59  ;;  %v530_v59 = vld [vmem:[%s3830_s1 + $0x2] sm:$0x1]  ;;  %2671 = vmatpush3.bf16.msra.mxu1 %v3412_v14 }
 0x700   :  { %2881 = vmatpush3.bf16.msra.mxu0 %v3181_v9  ;;  %2483 = vmatprep.mubr.msk.f32.mxu0 %vm3098_vm2, %v3099_v33 }
 0x701   :  { %2882 = vmatprep.subr.bf16.mxu0 %v3097_v0  ;;  %2672 = vmatprep.subr.bf16.mxu1 %v3097_v0 }
 0x703   :  { %2674 = vmatpush3.bf16.msra.mxu1 %v3416_v18 }
 0x704   :  { %2884 = vmatpush3.bf16.msra.mxu0 %v3184_v12  ;;  %2675 = vmatprep.subr.bf16.mxu1 %v3097_v0 }
 0x705   :  { %2885 = vmatprep.subr.bf16.mxu0 %v3097_v0 }
 0x707   :  { %2677 = vmatpush3.bf16.msra.mxu1 %v3420_v23 }
 0x708   :  { %2887 = vmatpush3.bf16.msra.mxu0 %v3189_v16  ;;  %2678 = vmatprep.subr.bf16.mxu1 %v3097_v0 }
 0x709   :  { %2888 = vmatprep.subr.bf16.mxu0 %v3097_v0 }
 0x70b   :  { %2680 = vmatpush3.bf16.msra.mxu1 %v3441_v46 }
 0x70c   :  { %2890 = vmatpush3.bf16.msra.mxu0 %v3193_v19  ;;  %2681 = vmatprep.subr.bf16.mxu1 %v3097_v0 }
 0x70d   :  { %2891 = vmatprep.subr.bf16.mxu0 %v3097_v0 }
 0x70f   :  { %2683 = vmatpush3.bf16.msra.mxu1 %v3445_v52 }
 0x710   :  { %2893 = vmatpush3.bf16.msra.mxu0 %v3198_v24  ;;  %2684 = vmatprep.subr.bf16.mxu1 %v3097_v0 }
 0x711   :  { %2894 = vmatprep.subr.bf16.mxu0 %v3097_v0 }
 0x713   :  { %2686 = vmatpush3.bf16.msra.mxu1 %v3451_v56 }
 0x714   :  { %2896 = vmatpush3.bf16.msra.mxu0 %v3203_v27  ;;  %2711 = vmatprep.subr.bf16.mxu1 %v3097_v0 }
 0x715   :  { %2897 = vmatprep.subr.bf16.mxu0 %v3097_v0 }
 0x718   :  { %2899 = vmatpush3.bf16.msra.mxu0 %v3207_v31 }
 0x719   :  { %2900 = vmatprep.subr.bf16.mxu0 %v3097_v0 }
 0x71c   :  { %2902 = vmatpush3.bf16.msra.mxu0 %v3215_v34 }
 0x71d   :  { %2927 = vmatprep.subr.bf16.mxu0 %v3097_v0 }
 0x7c9   :  { %v305_v42 = vpop.f32.mrb[0].mxu1 }
 0x7ca   :  { %v2100_v44 = vpop.f32.mrb[1].mxu1 }
 0x7d2   :  { %v1195_v26 = vpop.f32.mrb[10].mxu0 }
 0x7d3   :  { %3006 = vlog2.f32 %v1195_v26  ;;  %v2415_v28 = vpop.f32.mrb[11].mxu0 }
 0x7dd   :  { %v3007_v35 = vpop.eup %3006 }
 0x7de   :  { %v1201_v37 = vmul.f32 0.6931472, %v3007_v35 }
 0x7e0   :  { %v1202_v39 = vadd.f32 %v1201_v37, %v1199_v36 }
 0x7e2   :  { %v1208_v40 = vadd.f32 %v1206_v38, %v1202_v39 }
 0x7e4   :  { %v1316_v41 = vsel %vm135_vm1, %v1208_v40, -inf }
 0x7e5   :  { %1317 = vmax.xlane.f32.xlu0 %v1316_v41 }
 0x7fb   :  { %124 = vperm.xlu0 %2985, %v121_v55   ;;  %v120_v55 = vld [vmem:[%s3829_s0 + $0x8] sm:$0x1] }
 0x7ff   :  { %536 = vperm.xlu0 %2985, %v531_v57   ;;  %v230_v57 = vmul.f32 %v3505_v20, %v120_v55 }
 0x803   :  { %533 = vperm.xlu0 %2985, %v530_v59   ;;  %v119_v59 = vld [vmem:[%s3829_s0] sm:$0x1] }
 0x807   :  { %729 = vperm.xlu0 %2985, %v724_v60   ;;  %v233_v60 = vrot.slane %v230_v57, 7 }
 0x80b   :  { %726 = vperm.xlu0 %2985, %v723_v61  }
 0x80f   :  { %919 = vperm.xlu0 %2985, %v916_v62  }
 0x813   :  { %1115 = vperm.xlu0 %2985, %v1110_v63  }
 0x817   :  { %1112 = vperm.xlu0 %2985, %v1109_v3  }
 0x81b   :  { %1308 = vperm.xlu0 %2985, %v1303_v5  }
 0x872   :  { %v3500_v13 = vpop.xlane.xlu0 %1317 }
 0x873   :  { %v1319_v15 = vsub.f32 %v1208_v40, %v3500_v13 }
 0x875   :  { %v1320_v17 = vmul.f32 1.442695, %v1319_v15 }
 0x877   :  { %3008 = vpow2.f32 %v1320_v17 }
 0x87a   :  { %v125_v26 = vpop.permute.xlu0 %124 }
 0x87b   :  { %vm129_vm4 = vcmp.eq.s32.totalorder %v125_v26, %v3498_v8 }
 0x87c   :  { %v3510_v28 = vsel %vm129_vm4, 1.0, %v3099_v33 }
 0x87d   :  { %v3514_v30 = vsel %vm107_vm0, %v311_v21, %v3510_v28  ;;  %v229_v61 = vmul.f32 %v3510_v28, %v119_v59  ;;  %v917_v59 = vld [vmem:[%s3830_s1 + $0xc] sm:$0x1] }
 0x87e   :  { %2169 = vmatmul.mubr.f32.vlgmr.msra.gmra.mrb[2].mxu1 %v3514_v30  ;;  %v328_v3 = vmul.f32 %v3171_v1, %v3514_v30 }
 0x87f   :  { %2713 = vmatpush3.bf16.msra.mxu1 %v3405_v7  ;;  %2238 = vmatprep.mubr.msk.f32.mxu1 %vm3098_vm2, %v3099_v33 }
 0x880   :  { %2714 = vmatprep.subr.bf16.mxu1 %v3097_v0  ;;  %v329_v11 = vsel %vm135_vm1, %v328_v3, 0.0 }
 0x881   :  { %v3009_v35 = vpop.eup %3008 }
 0x882   :  { %2484 = vmatmul.mubr.f32.vlgmr.msra.gmra.mrb[12].mxu0 %v3009_v35 }
 0x883   :  { %2716 = vmatpush3.bf16.msra.mxu1 %v3408_v10  ;;  %2929 = vmatpush3.bf16.msra.mxu0 %v3181_v9  ;;  %v344_v9 = vpop.permute.xlu1 %343 }
 0x884   :  { %2717 = vmatprep.subr.bf16.mxu1 %v3097_v0  ;;  %2930 = vmatprep.subr.bf16.mxu0 %v3097_v0  ;;  %vm346_vm5 = vcmp.eq.s32.totalorder %v344_v9, %v3498_v8 }
 0x885   :  { %2553 = vmatprep.mubr.msk.f32.mxu0 %vm3098_vm2, %v3099_v33 }
 0x887   :  { %2719 = vmatpush3.bf16.msra.mxu1 %v3412_v14  ;;  %2932 = vmatpush3.bf16.msra.mxu0 %v3184_v12  ;;  %v341_v12 = vpop.permute.xlu1 %340 }
 0x888   :  { %2720 = vmatprep.subr.bf16.mxu1 %v3097_v0  ;;  %2933 = vmatprep.subr.bf16.mxu0 %v3097_v0  ;;  %vm345_vm6 = vcmp.eq.s32.totalorder %v341_v12, %v3498_v8 }
 0x889   :  { %v3553_v36 = vsel %vm345_vm6, 1.0, %v3099_v33 }
 0x88a   :  { %v437_v63 = vmul.f32 %v3553_v36, %v3270_v50 }
 0x88b   :  { %2722 = vmatpush3.bf16.msra.mxu1 %v3416_v18  ;;  %2935 = vmatpush3.bf16.msra.mxu0 %v3189_v16  ;;  %v3544_v16 = vsel %vm346_vm5, 1.0, %v3099_v33 }
 0x88c   :  { %2723 = vmatprep.subr.bf16.mxu1 %v3097_v0  ;;  %2936 = vmatprep.subr.bf16.mxu0 %v3097_v0  ;;  %v438_v58 = vmul.f32 %v3544_v16, %v3259_v47  ;;  %v234_v47 = vsel %vm107_vm0, %v233_v60, %v229_v61  ;;  %v1302_v60 = vld [vmem:[%s3830_s1 + $0x6] sm:$0x1] }
 0x88d   :  { %v236_v6 = vsel %vm135_vm1, %v234_v47, 0.0 }
 0x88e   :  { %v441_v62 = vrot.slane %v438_v58, 7  ;;  %237 = vadd.xlane.f32.xlu0 %v236_v6 }
 0x88f   :  { %2725 = vmatpush3.bf16.msra.mxu1 %v3420_v23  ;;  %2938 = vmatpush3.bf16.msra.mxu0 %v3193_v19  ;;  %v519_v19 = vrot.slane %v3544_v16, 7 }
 0x890   :  { %2726 = vmatprep.subr.bf16.mxu1 %v3097_v0  ;;  %2939 = vmatprep.subr.bf16.mxu0 %v3097_v0  ;;  %v442_v5 = vsel %vm107_vm0, %v441_v62, %v437_v63 }
 0x891   :  { %v444_v15 = vsel %vm135_vm1, %v442_v5, 0.0 }
 0x892   :  { %330 = vadd.xlane.f32.xlu0 %v329_v11 }
 0x893   :  { %2728 = vmatpush3.bf16.msra.mxu1 %v3441_v46  ;;  %2941 = vmatpush3.bf16.msra.mxu0 %v3198_v24  ;;  %v3559_v24 = vsel %vm107_vm0, %v519_v19, %v3553_v36 }
 0x894   :  { %2729 = vmatprep.subr.bf16.mxu1 %v3097_v0  ;;  %2942 = vmatprep.subr.bf16.mxu0 %v3097_v0 }
 0x896   :  { %445 = vadd.xlane.f32.xlu0 %v444_v15 }
 0x897   :  { %2731 = vmatpush3.bf16.msra.mxu1 %v3445_v52  ;;  %2944 = vmatpush3.bf16.msra.mxu0 %v3203_v27  ;;  %v537_v27 = vpop.permute.xlu0 %536 }
 0x898   :  { %2732 = vmatprep.subr.bf16.mxu1 %v3097_v0  ;;  %2945 = vmatprep.subr.bf16.mxu0 %v3097_v0  ;;  %vm539_vm7 = vcmp.eq.s32.totalorder %v537_v27, %v3498_v8 }
 0x89b   :  { %2734 = vmatpush3.bf16.msra.mxu1 %v3451_v56  ;;  %2947 = vmatpush3.bf16.msra.mxu0 %v3207_v31  ;;  %v534_v31 = vpop.permute.xlu0 %533 }
 0x89c   :  { %2759 = vmatprep.subr.bf16.mxu1 %v3097_v0  ;;  %2948 = vmatprep.subr.bf16.mxu0 %v3097_v0  ;;  %vm538_vm8 = vcmp.eq.s32.totalorder %v534_v31, %v3498_v8 }
 0x89d   :  { %v3589_v38 = vsel %vm538_vm8, 1.0, %v3099_v33 }
 0x89e   :  { %2239 = vmatmul.mubr.f32.vlgmr.msra.gmra.mrb[4].mxu1 %v3559_v24  ;;  %v630_v20 = vmul.f32 %v3589_v38, %v3303_v4 }
 0x89f   :  { %2761 = vmatpush3.bf16.msra.mxu1 %v3405_v7  ;;  %2308 = vmatprep.mubr.msk.f32.mxu1 %vm3098_vm2, %v3099_v33  ;;  %v730_v40 = vpop.permute.xlu0 %729 }
 0x8a0   :  { %2762 = vmatprep.subr.bf16.mxu1 %v3097_v0  ;;  %2950 = vmatpush3.bf16.msra.mxu0 %v3215_v34  ;;  %v3582_v34 = vsel %vm539_vm7, 1.0, %v3099_v33  ;;  %vm732_vm9 = vcmp.eq.s32.totalorder %v730_v40, %v3498_v8  ;;  %v1301_v40 = vld [vmem:[%s3829_s0 + $0xe] sm:$0x1] }
 0x8a1   :  { %v712_v37 = vrot.slane %v3582_v34, 7  ;;  %v1748_v49 = vsel %vm732_vm9, 1.0, %v3099_v33  ;;  %v631_v50 = vmul.f32 %v3582_v34, %v3297_v2 }
 0x8a2   :  { %v905_v51 = vrot.slane %v1748_v49, 7  ;;  %v824_v1 = vmul.f32 %v1748_v49, %v3330_v22 }
 0x8a3   :  { %2764 = vmatpush3.bf16.msra.mxu1 %v3408_v10  ;;  %v3594_v39 = vsel %vm107_vm0, %v712_v37, %v3589_v38  ;;  %v727_v41 = vpop.permute.xlu0 %726  ;;  %v634_v17 = vrot.slane %v631_v50, 7  ;;  %v116_v50 = vld [vmem:[#allocation4] sm:$0x3] }
 0x8a4   :  { %2765 = vmatprep.subr.bf16.mxu1 %v3097_v0  ;;  %vm731_vm10 = vcmp.eq.s32.totalorder %v727_v41, %v3498_v8  ;;  %v827_v26 = vrot.slane %v824_v1, 7  ;;  %v1300_v41 = vld [vmem:[%s3829_s0 + $0x6] sm:$0x1] }
 0x8a5   :  { %v1747_v53 = vsel %vm731_vm10, 1.0, %v3099_v33  ;;  %v635_v30 = vsel %vm107_vm0, %v634_v17, %v630_v20 }
 0x8a6   :  { %v3620_v54 = vsel %vm107_vm0, %v905_v51, %v1747_v53  ;;  %v823_v28 = vmul.f32 %v1747_v53, %v3336_v25  ;;  %v637_v35 = vsel %vm135_vm1, %v635_v30, 0.0 }
 0x8a7   :  { %2767 = vmatpush3.bf16.msra.mxu1 %v3412_v14  ;;  %v3666_v21 = vpop.permute.xlu0 %919  ;;  %638 = vadd.xlane.f32.xlu0 %v637_v35 }
 0x8a8   :  { %2768 = vmatprep.subr.bf16.mxu1 %v3097_v0  ;;  %v828_v12 = vsel %vm107_vm0, %v827_v26, %v823_v28  ;;  %vm924_vm15 = vcmp.eq.s32.totalorder %v3666_v21, %v3498_v8 }
 0x8a9   :  { %v830_v2 = vsel %vm135_vm1, %v828_v12, 0.0  ;;  %v1749_v12 = vsel %vm924_vm15, 1.0, %v3099_v33 }
 0x8aa   :  { %v1016_v21 = vmul.f32 %v1749_v12, %v3369_v45 }
 0x8ab   :  { %2770 = vmatpush3.bf16.msra.mxu1 %v3416_v18  ;;  %v1116_v9 = vpop.permute.xlu0 %1115  ;;  %831 = vadd.xlane.f32.xlu0 %v830_v2 }
 0x8ac   :  { %2771 = vmatprep.subr.bf16.mxu1 %v3097_v0  ;;  %vm1118_vm11 = vcmp.eq.s32.totalorder %v1116_v9, %v3498_v8 }
 0x8ad   :  { %v3675_v4 = vsel %vm1118_vm11, 1.0, %v3099_v33 }
 0x8ae   :  { %v1210_v25 = vmul.f32 %v3675_v4, %v3428_v29  ;;  %v1398_v29 = vrot.slane %v1301_v40, 7 }
 0x8af   :  { %2773 = vmatpush3.bf16.msra.mxu1 %v3420_v23  ;;  %v1113_v22 = vpop.permute.xlu0 %1112 }
 0x8b0   :  { %2774 = vmatprep.subr.bf16.mxu1 %v3097_v0  ;;  %vm1117_vm12 = vcmp.eq.s32.totalorder %v1113_v22, %v3498_v8  ;;  %v1213_v19 = vrot.slane %v1210_v25, 7  ;;  %v1399_v49 = vsel %vm107_vm0, %v1398_v29, %v1300_v41 }
 0x8b1   :  { %v3681_v16 = vsel %vm1117_vm12, 1.0, %v3099_v33 }
 0x8b2   :  { %v1209_v36 = vmul.f32 %v3681_v16, %v3434_v32  ;;  %v1392_v32 = vadd.f32 %v3264_v48, %v3500_v13 }
 0x8b3   :  { %2776 = vmatpush3.bf16.msra.mxu1 %v3441_v46  ;;  %v1309_v6 = vpop.permute.xlu0 %1308 }
 0x8b4   :  { %2777 = vmatprep.subr.bf16.mxu1 %v3097_v0  ;;  %v3686_v27 = vsel %vm107_vm0, %v1213_v19, %v1209_v36  ;;  %vm1311_vm14 = vcmp.eq.s32.totalorder %v1309_v6, %v3498_v8  ;;  %v3020_v6 = vld [vmem:[%s3833_s4] ss:$0 sm:$0xff] }
 0x8b5   :  { %v3721_v35 = vsel %vm1311_vm14, 1.0, %v3099_v33 }
 0x8b6   :  { %v1403_v22 = vmul.f32 %v3721_v35, %v1301_v40 }
 0x8b7   :  { %2779 = vmatpush3.bf16.msra.mxu1 %v3445_v52 }
 0x8b8   :  { %2780 = vmatprep.subr.bf16.mxu1 %v3097_v0  ;;  %v1406_v29 = vrot.slane %v1403_v22, 7 }
 0x8bb   :  { %2782 = vmatpush3.bf16.msra.mxu1 %v3451_v56 }
 0x8bc   :  { %2807 = vmatprep.subr.bf16.mxu1 %v3097_v0 }
 0x8be   :  { %2309 = vmatmul.mubr.f32.vlgmr.msra.gmra.mrb[6].mxu1 %v3594_v39 }
 0x8bf   :  { %2809 = vmatpush3.bf16.msra.mxu1 %v3405_v7  ;;  %2378 = vmatprep.mubr.msk.f32.mxu1 %vm3098_vm2, %v3099_v33 }
 0x8c0   :  { %2810 = vmatprep.subr.bf16.mxu1 %v3097_v0 }
 0x8c3   :  { %2812 = vmatpush3.bf16.msra.mxu1 %v3408_v10 }
 0x8c4   :  { %2813 = vmatprep.subr.bf16.mxu1 %v3097_v0 }
 0x8c7   :  { %2815 = vmatpush3.bf16.msra.mxu1 %v3412_v14 }
 0x8c8   :  { %2816 = vmatprep.subr.bf16.mxu1 %v3097_v0 }
 0x8cb   :  { %2818 = vmatpush3.bf16.msra.mxu1 %v3416_v18 }
 0x8cc   :  { %2819 = vmatprep.subr.bf16.mxu1 %v3097_v0 }
 0x8cf   :  { %2821 = vmatpush3.bf16.msra.mxu1 %v3420_v23 }
 0x8d0   :  { %2822 = vmatprep.subr.bf16.mxu1 %v3097_v0 }
 0x8d3   :  { %2824 = vmatpush3.bf16.msra.mxu1 %v3441_v46 }
 0x8d4   :  { %2825 = vmatprep.subr.bf16.mxu1 %v3097_v0 }
 0x8d7   :  { %2827 = vmatpush3.bf16.msra.mxu1 %v3445_v52 }
 0x8d8   :  { %2828 = vmatprep.subr.bf16.mxu1 %v3097_v0 }
 0x8db   :  { %2830 = vmatpush3.bf16.msra.mxu1 %v3451_v56 }
 0x8dc   :  { %2855 = vmatprep.subr.bf16.mxu1 %v3097_v0 }
 0x8de   :  { %2379 = vmatmul.mubr.f32.vlgmr.msra.gmra.mrb[8].mxu1 %v3620_v54 }
 0x8df   :  { %2857 = vmatpush3.bf16.msra.mxu1 %v3405_v7  ;;  %2448 = vmatprep.mubr.msk.f32.mxu1 %vm3098_vm2, %v3099_v33 }
 0x8e0   :  { %2858 = vmatprep.subr.bf16.mxu1 %v3097_v0 }
 0x8e3   :  { %2860 = vmatpush3.bf16.msra.mxu1 %v3408_v10 }
 0x8e4   :  { %2861 = vmatprep.subr.bf16.mxu1 %v3097_v0 }
 0x8e7   :  { %2863 = vmatpush3.bf16.msra.mxu1 %v3412_v14 }
 0x8e8   :  { %2864 = vmatprep.subr.bf16.mxu1 %v3097_v0 }
 0x8eb   :  { %2866 = vmatpush3.bf16.msra.mxu1 %v3416_v18 }
 0x8ec   :  { %2867 = vmatprep.subr.bf16.mxu1 %v3097_v0 }
 0x8ef   :  { %2869 = vmatpush3.bf16.msra.mxu1 %v3420_v23 }
 0x8f0   :  { %2870 = vmatprep.subr.bf16.mxu1 %v3097_v0 }
 0x8f3   :  { %2872 = vmatpush3.bf16.msra.mxu1 %v3441_v46 }
 0x8f4   :  { %2873 = vmatprep.subr.bf16.mxu1 %v3097_v0 }
 0x8f7   :  { %2875 = vmatpush3.bf16.msra.mxu1 %v3445_v52 }
 0x8f8   :  { %2876 = vmatprep.subr.bf16.mxu1 %v3097_v0 }
 0x8fb   :  { %2878 = vmatpush3.bf16.msra.mxu1 %v3451_v56 }
 0x8fc   :  { %2903 = vmatprep.subr.bf16.mxu1 %v3097_v0 }
 0x91b   :  { %v238_v11 = vpop.xlane.xlu0 %237 }
 0x91c   :  { %v332_v17 = vadd.f32 %v238_v11, %v116_v50  ;;  %v1757_v50 = vld [vmem:[%s3835_s6] ss:$0 sm:$0xff] }
 0x951   :  { %v513_v31 = vpop.f32.mrb[2].mxu1 }
 0x952   :  { %v2170_v34 = vpop.f32.mrb[3].mxu1  ;;  %v522_v61 = vmul.f32 %v3559_v24, %v513_v31 }
 0x954   :  { %v523_v63 = vsel %vm135_vm1, %v522_v61, 0.0 }
 0x955   :  { %v1388_v37 = vpop.f32.mrb[12].mxu0 }
 0x956   :  { %3010 = vlog2.f32 %v1388_v37  ;;  %v2485_v38 = vpop.f32.mrb[13].mxu0 }
 0x960   :  { %v3011_v42 = vpop.eup %3010 }
 0x961   :  { %v1394_v44 = vmul.f32 0.6931472, %v3011_v42 }
 0x963   :  { %v1395_v51 = vadd.f32 %v1394_v44, %v1392_v32 }
 0x965   :  { %v1401_v53 = vadd.f32 %v1399_v49, %v1395_v51  ;;  %v1291_v49 = vrot.slane %v3675_v4, 7 }
 0x967   :  { %v1509_v55 = vsel %vm135_vm1, %v1401_v53, -inf  ;;  %v1292_v51 = vsel %vm107_vm0, %v1291_v49, %v3681_v16 }
 0x968   :  { %1510 = vmax.xlane.f32.xlu1 %v1509_v55 }
 0x971   :  { %v706_v57 = vpop.f32.mrb[4].mxu1 }
 0x972   :  { %v2240_v58 = vpop.f32.mrb[5].mxu1  ;;  %v715_v62 = vmul.f32 %v3594_v39, %v706_v57  ;;  %v331_v39 = vpop.xlane.xlu0 %330 }
 0x973   :  { %v334_v1 = vadd.f32 %v332_v17, %v331_v39 }
 0x974   :  { %v716_v3 = vsel %vm135_vm1, %v715_v62, 0.0 }
 0x976   :  { %v446_v20 = vpop.xlane.xlu0 %445 }
 0x979   :  { %922 = vperm.xlu1 %2984, %v917_v59  }
 0x97a   :  { %v639_v16 = vpop.xlane.xlu0 %638 }
 0x97d   :  { %1305 = vperm.xlu1 %2984, %v1302_v60  }
 0x991   :  { %v899_v48 = vpop.f32.mrb[6].mxu1 }
 0x992   :  { %v2310_v13 = vpop.f32.mrb[7].mxu1  ;;  %v908_v47 = vmul.f32 %v3620_v54, %v899_v48  ;;  %v3712_v54 = vadd.f32 %v446_v20, %v334_v1 }
 0x994   :  { %v909_v5 = vsel %vm135_vm1, %v908_v47, 0.0 }
 0x9a1   :  { %524 = vadd.xlane.f32.xlu1 %v523_v63  ;;  %v1494_v63 = vld [vmem:[%s3829_s0 + $0xf] sm:$0x1] }
 0x9a2   :  { %v1591_v47 = vrot.slane %v1494_v63, 7 }
 0x9a5   :  { %717 = vadd.xlane.f32.xlu1 %v716_v3  ;;  %v1493_v3 = vld [vmem:[%s3829_s0 + $0x7] sm:$0x1] }
 0x9a9   :  { %910 = vadd.xlane.f32.xlu1 %v909_v5 }
 0x9b1   :  { %v1092_v24 = vpop.f32.mrb[8].mxu1 }
 0x9b2   :  { %v2380_v15 = vpop.f32.mrb[9].mxu1 }
 0x9b3   :  { %v1592_v15 = vsel %vm107_vm0, %v1591_v47, %v1493_v3 }
 0x9f5   :  { %v3714_v26 = vpop.xlane.xlu1 %1510 }
 0x9f6   :  { %v1512_v28 = vsub.f32 %v1401_v53, %v3714_v26  ;;  %v1585_v11 = vadd.f32 %v3020_v6, %v3714_v26  ;;  %v1495_v26 = vld [vmem:[%s3830_s1 + $0x7] sm:$0x1] }
 0x9f8   :  { %v1513_v30 = vmul.f32 1.442695, %v1512_v28 }
 0x9f9   :  { %v923_v9 = vpop.permute.xlu1 %922 }
 0x9fa   :  { %3012 = vpow2.f32 %v1513_v30  ;;  %vm925_vm3 = vcmp.eq.s32.totalorder %v923_v9, %v3498_v8 }
 0x9fb   :  { %v1750_v2 = vsel %vm925_vm3, 1.0, %v3099_v33 }
 0x9fc   :  { %v1017_v25 = vmul.f32 %v1750_v2, %v3363_v43  ;;  %v1098_v19 = vrot.slane %v1750_v2, 7 }
 0x9fd   :  { %v1306_v36 = vpop.permute.xlu1 %1305 }
 0x9fe   :  { %v1020_v31 = vrot.slane %v1017_v25, 7  ;;  %vm1310_vm4 = vcmp.eq.s32.totalorder %v1306_v36, %v3498_v8  ;;  %v1099_v34 = vsel %vm107_vm0, %v1098_v19, %v1749_v12  ;;  %v1216_v12 = vsel %vm135_vm1, %v3686_v27, 0.0 }
 0x9ff   :  { %v1753_v37 = vsel %vm1310_vm4, 1.0, %v3099_v33  ;;  %v1101_v38 = vmul.f32 %v1099_v34, %v1092_v24  ;;  %2449 = vmatmul.mubr.f32.vlgmr.msra.gmra.mrb[10].mxu1 %v1099_v34 }
 0xa00   :  { %v1402_v42 = vmul.f32 %v1753_v37, %v1300_v41  ;;  %2905 = vmatpush3.bf16.msra.mxu1 %v3405_v7  ;;  %v1021_v40 = vsel %vm107_vm0, %v1020_v31, %v1016_v21  ;;  %2518 = vmatprep.mubr.msk.f32.mxu1 %vm3098_vm2, %v3099_v33  ;;  %v1496_v41 = vld [vmem:[%s3830_s1 + $0xf] sm:$0x1]  ;;  %s3101_s1 = smov [#allocation10]  }
 0xa01   :  { %2906 = vmatprep.subr.bf16.mxu1 %v3097_v0  ;;  %v1102_v43 = vsel %vm135_vm1, %v1101_v38, 0.0  ;;  %v1023_v45 = vsel %vm135_vm1, %v1021_v40, 0.0  ;;  %s1730_s6 = sshll.u32 %s3101_s1, 4  ;;  %s1731_s6 = int_to_ptr.vmem [resolvable:$true] %s1730_s6 }
 0xa02   :  { %1103 = vadd.xlane.f32.xlu1 %v1102_v43  ;;  %1024 = vadd.xlane.f32.xlu0 %v1023_v45  ;;  %v1407_v32 = vsel %vm107_vm0, %v1406_v29, %v1402_v42  ;;  %s3065_s23 = scalar_lea.vmem %s1731_s6, 32  ;;  %p3070_p3 = scmp.lt.s32.totalorder %s1731_s6, %s1731_s6 }
 0xa03   :  { %p3066_p2 = scmp.ne.s32.totalorder %s1731_s6, %s3065_s23  ;;  %p3071_p4 = scmp.lt.s32.totalorder %s3065_s23, %s3065_s23 }
 0xa04   :  { %v3013_v44 = vpop.eup %3012  ;;  %2908 = vmatpush3.bf16.msra.mxu1 %v3408_v10 }
 0xa05   :  { %2554 = vmatmul.mubr.f32.vlgmr.msra.gmra.mrb[14].mxu0 %v3013_v44  ;;  %2909 = vmatprep.subr.bf16.mxu1 %v3097_v0  ;;  %p3072_p5 = por %p3071_p4, %p3070_p3 }
 0xa07   :  { %p3073_p6 = pnand %p3072_p5, %p3066_p2 }
 0xa08   :  { %2911 = vmatpush3.bf16.msra.mxu1 %v3412_v14 }
 0xa09   :  { %2912 = vmatprep.subr.bf16.mxu1 %v3097_v0 }
 0xa0c   :  { %2914 = vmatpush3.bf16.msra.mxu1 %v3416_v18 }
 0xa0d   :  { %2915 = vmatprep.subr.bf16.mxu1 %v3097_v0 }
 0xa10   :  { %2917 = vmatpush3.bf16.msra.mxu1 %v3420_v23 }
 0xa11   :  { %2918 = vmatprep.subr.bf16.mxu1 %v3097_v0 }
 0xa14   :  { %2920 = vmatpush3.bf16.msra.mxu1 %v3441_v46 }
 0xa15   :  { %2921 = vmatprep.subr.bf16.mxu1 %v3097_v0 }
 0xa18   :  { %2923 = vmatpush3.bf16.msra.mxu1 %v3445_v52  ;;  %1501 = vperm.xlu0 %2985, %v1496_v41  }
 0xa19   :  { %2924 = vmatprep.subr.bf16.mxu1 %v3097_v0 }
 0xa1c   :  { %2926 = vmatpush3.bf16.msra.mxu1 %v3451_v56 }
 0xa1d   :  { %2951 = vmatprep.subr.bf16.mxu1 %v3097_v0 }
 0xa1f   :  { %2519 = vmatmul.mubr.f32.vlgmr.msra.gmra.mrb[12].mxu1 %v1292_v51 }
 0xa20   :  { %2953 = vmatpush3.bf16.msra.mxu1 %v3405_v7  ;;  %2588 = vmatprep.mubr.msk.f32.mxu1 %vm3098_vm2, %v3099_v33 }
 0xa21   :  { %2954 = vmatprep.subr.bf16.mxu1 %v3097_v0 }
 0xa24   :  { %2956 = vmatpush3.bf16.msra.mxu1 %v3408_v10 }
 0xa25   :  { %2957 = vmatprep.subr.bf16.mxu1 %v3097_v0 }
 0xa28   :  { %2959 = vmatpush3.bf16.msra.mxu1 %v3412_v14  ;;  %v1484_v14 = vrot.slane %v3721_v35, 7 }
 0xa29   :  { %2960 = vmatprep.subr.bf16.mxu1 %v3097_v0 }
 0xa2c   :  { %2962 = vmatpush3.bf16.msra.mxu1 %v3416_v18  ;;  %v1485_v18 = vsel %vm107_vm0, %v1484_v14, %v1753_v37 }
 0xa2d   :  { %2963 = vmatprep.subr.bf16.mxu1 %v3097_v0 }
 0xa2e   :  { %v525_v4 = vpop.xlane.xlu1 %524 }
 0xa2f   :  { %v527_v7 = vadd.f32 %v3712_v54, %v525_v4 }
 0xa30   :  { %2965 = vmatpush3.bf16.msra.mxu1 %v3420_v23  ;;  %v832_v23 = vpop.xlane.xlu0 %831 }
 0xa31   :  { %2966 = vmatprep.subr.bf16.mxu1 %v3097_v0  ;;  %v719_v53 = vadd.f32 %v639_v16, %v527_v7 }
 0xa32   :  { %v718_v10 = vpop.xlane.xlu1 %717 }
 0xa33   :  { %v720_v55 = vadd.f32 %v719_v53, %v718_v10 }
 0xa34   :  { %2968 = vmatpush3.bf16.msra.mxu1 %v3441_v46 }
 0xa35   :  { %2969 = vmatprep.subr.bf16.mxu1 %v3097_v0  ;;  %v912_v57 = vadd.f32 %v832_v23, %v720_v55 }
 0xa36   :  { %v911_v58 = vpop.xlane.xlu1 %910 }
 0xa37   :  { %v913_v59 = vadd.f32 %v912_v57, %v911_v58 }
 0xa38   :  { %2971 = vmatpush3.bf16.msra.mxu1 %v3445_v52 }
 0xa39   :  { %2972 = vmatprep.subr.bf16.mxu1 %v3097_v0 }
 0xa3c   :  { %2974 = vmatpush3.bf16.msra.mxu1 %v3451_v56  ;;  %v1409_v56 = vsel %vm135_vm1, %v1407_v32, 0.0 }
 0xa3f   :  { %2589 = vmatmul.mubr.f32.vlgmr.msra.gmra.mrb[14].mxu1 %v1485_v18 }
 0xa8f   :  { %v1025_v60 = vpop.xlane.xlu0 %1024  ;;  %v1104_v25 = vpop.xlane.xlu1 %1103 }
 0xa90   :  { %v3780_v48 = vadd.f32 %v1025_v60, %v913_v59 }
 0xa92   :  { %v1106_v4 = vadd.f32 %v3780_v48, %v1104_v25 }
 0xa97   :  { %v1502_v22 = vpop.permute.xlu0 %1501 }
 0xa98   :  { %vm1504_vm2 = vcmp.eq.s32.totalorder %v1502_v22, %v3498_v8 }
 0xa99   :  { %v1756_v19 = vsel %vm1504_vm2, 1.0, %v3099_v33 }
 0xa9a   :  { %v1596_v31 = vmul.f32 %v1756_v19, %v1494_v63  ;;  %v1677_v38 = vrot.slane %v1756_v19, 7 }
 0xa9c   :  { %v1599_v29 = vrot.slane %v1596_v31, 7 }
 0xad2   :  { %v1285_v46 = vpop.f32.mrb[10].mxu1 }
 0xad3   :  { %v1294_v13 = vmul.f32 %v1292_v51, %v1285_v46  ;;  %v2450_v61 = vpop.f32.mrb[11].mxu1 }
 0xad5   :  { %v1295_v52 = vsel %vm135_vm1, %v1294_v13, 0.0 }
 0xad6   :  { %1296 = vadd.xlane.f32.xlu0 %v1295_v52 }
 0xad8   :  { %v1581_v0 = vpop.f32.mrb[14].mxu0 }
 0xad9   :  { %3014 = vlog2.f32 %v1581_v0  ;;  %v2555_v62 = vpop.f32.mrb[15].mxu0 }
 0xada   :  { %1410 = vadd.xlane.f32.xlu0 %v1409_v56 }
 0xae3   :  { %v3015_v5 = vpop.eup %3014 }
 0xae4   :  { %v1587_v24 = vmul.f32 0.6931472, %v3015_v5 }
 0xae6   :  { %v1588_v39 = vadd.f32 %v1587_v24, %v1585_v11 }
 0xae8   :  { %v1594_v17 = vadd.f32 %v1592_v15, %v1588_v39 }
 0xaea   :  { %v1699_v20 = vadd.f32 %v1757_v50, %v1594_v17  ;;  %1686 = vst [vmem:[#allocation2] sm:$0x3] %v1594_v17 }
 0xaec   :  { %v1700_v1 = vsel %vm135_vm1, %v1699_v20, -inf }
 0xaed   :  { %1701 = vmax.xlane.f32.xlu1 %v1700_v1 }
 0xaf2   :  { %v1478_v54 = vpop.f32.mrb[12].mxu1 }
 0xaf3   :  { %v2520_v28 = vpop.f32.mrb[13].mxu1  ;;  %v1487_v9 = vmul.f32 %v1485_v18, %v1478_v54 }
 0xaf5   :  { %v1488_v2 = vsel %vm135_vm1, %v1487_v9, 0.0 }
 0xafe   :  { %1498 = vperm.xlu1 %2984, %v1495_v26  }
 0xb12   :  { %v1671_v30 = vpop.f32.mrb[14].mxu1 }
 0xb13   :  { %v2590_v35 = vpop.f32.mrb[15].mxu1 }
 0xb22   :  { %1217 = vadd.xlane.f32.xlu1 %v1216_v12 }
 0xb26   :  { %1489 = vadd.xlane.f32.xlu1 %v1488_v2 }
 0xb63   :  { %v1297_v7 = vpop.xlane.xlu0 %1296 }
 0xb67   :  { %v1411_v10 = vpop.xlane.xlu0 %1410 }
 0xb7a   :  { %v1702_v36 = vpop.xlane.xlu1 %1701 }
 0xb7b   :  { %v1703_v21 = vsub.f32 %v1699_v20, %v1702_v36 }
 0xb7d   :  { %v1704_v34 = vmul.f32 1.442695, %v1703_v21 }
 0xb7e   :  { %v1499_v37 = vpop.permute.xlu1 %1498 }
 0xb7f   :  { %3016 = vpow2.f32 %v1704_v34  ;;  %vm1503_vm5 = vcmp.eq.s32.totalorder %v1499_v37, %v3498_v8 }
 0xb80   :  { %v1755_v27 = vsel %vm1503_vm5, 1.0, %v3099_v33 }
 0xb81   :  { %v1595_v42 = vmul.f32 %v1755_v27, %v1493_v3  ;;  %v1678_v40 = vsel %vm107_vm0, %v1677_v38, %v1755_v27 }
 0xb82   :  { %1687 = vst [vmem:[#allocation3] sm:$0x3] %v1678_v40  ;;  %v1680_v43 = vmul.f32 %v1678_v40, %v1671_v30  ;;  %v1712_v41 = vmul.f32 %v1757_v50, %v1678_v40 }
 0xb83   :  { %v1600_v45 = vsel %vm107_vm0, %v1599_v29, %v1595_v42 }
 0xb84   :  { %v1681_v32 = vsel %vm135_vm1, %v1680_v43, 0.0  ;;  %v1602_v44 = vsel %vm135_vm1, %v1600_v45, 0.0  ;;  %v1713_v49 = vsel %vm135_vm1, %v1712_v41, 0.0 }
 0xb85   :  { %1682 = vadd.xlane.f32.xlu1 %v1681_v32  ;;  %1603 = vadd.xlane.f32.xlu0 %v1602_v44 }
 0xb89   :  { %v3017_v8 = vpop.eup %3016  ;;  %1714 = vadd.xlane.f32.xlu1 %v1713_v49 }
 0xb8a   :  { %v1706_v33 = vsel %vm135_vm1, %v3017_v8, 0.0 }
 0xb8b   :  { %1707 = vadd.xlane.f32.xlu0 %v1706_v33 }
 0xbaf   :  { %v1218_v51 = vpop.xlane.xlu1 %1217 }
 0xbb0   :  { %v1298_v16 = vadd.f32 %v1218_v51, %v1106_v4 }
 0xbb2   :  { %v1299_v53 = vadd.f32 %v1298_v16, %v1297_v7 }
 0xbb3   :  { %v1490_v14 = vpop.xlane.xlu1 %1489 }
 0xbb4   :  { %v1491_v55 = vadd.f32 %v1411_v10, %v1299_v53 }
 0xbb6   :  { %v1492_v18 = vadd.f32 %v1491_v55, %v1490_v14 }
 0xc12   :  { %v1604_v23 = vpop.xlane.xlu0 %1603  ;;  %v1683_v58 = vpop.xlane.xlu1 %1682 }
 0xc13   :  { %v1684_v57 = vadd.f32 %v1604_v23, %v1492_v18 }
 0xc15   :  { %v1685_v59 = vadd.f32 %v1684_v57, %v1683_v58 }
 0xc16   :  { %v1715_v13 = vpop.xlane.xlu1 %1714 }
 0xc17   :  { %1689 = vst.msk [vmem:[#allocation4] sm:$0x3] %vm112_vm13, %v1685_v59  ;;  %v1716_v52 = vadd.f32 %v1715_v13, %v1685_v59 }
 0xc18   :  { %v1708_v60 = vpop.xlane.xlu0 %1707 }
 0xc19   :  { %3018 = vlog2.f32 %v1708_v60 }
 0xc23   :  { %v3019_v46 = vpop.eup %3018 }
 0xc24   :  { %v1710_v61 = vmul.f32 0.6931472, %v3019_v46 }
 0xc26   :  { %v1711_v48 = vadd.f32 %v1710_v61, %v1702_v36 }
 0xc28   :  { %v1717_v0 = vsub.f32 %v1711_v48, %v1716_v52 }
 0xc2a   :  { %1720 = vperm.xlu0 %2985, %v1717_v0  }
 0xca9   :  { %v1721_v62 = vpop.permute.xlu0 %1720 }
 0xcaa   :  { %1723 = vst [vmem:[#allocation10] sm:$0x3] %v1721_v62 }
 0xcab   :  { %3076 = shalt.err (!%p3073_p6)
}
 0xcac   :  { %s3077_s25 = scalar_lea.hbm %s3836_s7, 32 }
 0xcad   :  { %p3078_p7 = scmp.ne.s32.totalorder %s3836_s7, %s3077_s25  ;;  %p3081_p8 = scmp.lt.u32.totalorder %s3077_s25, %s3836_s7 }
 0xcaf   :  { %p3083_p9 = pnand %p3081_p8, %p3078_p7 }
 0xcb1   :  { %3086 = shalt.err (!%p3083_p9)
}
 0xcb2   :  { %1733 = dma.vmem_to_hbm [thread:$0]  %s1731_s6, 32, %s3836_s7, [#allocation7]  }
 0xcb3   :  { %3091 = dma.done.wait [#allocation7], 32  }
 0xcb4   :  { %3092 = vsyncadd [#allocation7], 4294967264 }
 0xcb5   :  { %1737 = vsyncpa [#allocation6], 1 }
 0xcb6   :  { %1738 = vsyncpa [#allocation9], 1 }
 0xcb7   :  { %1739 = vsyncpa [#allocation7], 1 }

</bundles_post_ra>
